<compile_context>
chip_gen: v7x
topology: tpu7x:2x2x1
jax: 0.10.0
libtpu: 0.0.40
codegen_flags: <defaults>
</compile_context>

<pallas_src>
import functools

import jax
import jax.numpy as jnp
from jax.experimental import pallas as pl
from jax.experimental.pallas import tpu as pltpu


# -----------------------------------------------------------------------------
# Fused Pallas kernel
# -----------------------------------------------------------------------------

def _fused_hcitengl_kernel(
        srcv_ref, segv_ref, wflat_ref, sel_ref, selT_ref, sumselqw1_ref,
        qb1_ref, qw2h1w_ref, qb2h1w_ref, h1b_ref, h2w_ref, h2b_ref,
        hd_ref, he_ref, a_ref, rw_ref, rb_ref,
        linw_ref, linb_ref,
        out_ref, *, num_rel, hidden):
    dot = functools.partial(jnp.dot, preferred_element_type=jnp.float32)

    def hconv(xw, bias):
        # D^-1 H B^-1 H^T (X W) + b; Hd/He are bf16, activations cast to bf16,
        # accumulation in f32 on the MXU.
        e = dot(he_ref[...], xw.astype(jnp.bfloat16))
        return dot(hd_ref[...], e.astype(jnp.bfloat16)) + bias

    # ---- LiteratureEmbedding on a lane-dense (N, E*L) slab (f32) -------------
    # f = (normalize(w * srcv, dim=E) + normalize(segv, dim=E)).sum(over L)
    # flat index i = e*L + l  (PyTorch .view(-1, E, L) memory reinterpretation)
    x = srcv_ref[...] * wflat_ref[...]                       # (N, E*L)
    s = segv_ref[...]                                        # (N, E*L)
    eps2 = 1e-24                                             # (F.normalize eps)^2
    # per-(n, l) squared E-norm via selector matmul on the MXU -> (N, L)
    x_inv = jax.lax.rsqrt(jnp.maximum(dot(x * x, sel_ref[...]), eps2))
    s_inv = jax.lax.rsqrt(jnp.maximum(dot(s * s, sel_ref[...]), eps2))
    # broadcast (N, L) back to (N, E*L) via selector transpose (MXU)
    y = x * dot(x_inv, selT_ref[...]) + s * dot(s_inv, selT_ref[...])

    # ---- query MLP layer 1 (folded with the sum-over-L selector) -------------
    # (y @ sumsel) @ qw1 == y @ (sumsel @ qw1)   -- one 256-deep contraction
    h = jnp.maximum(dot(y, sumselqw1_ref[...]) + qb1_ref[...], 0.0)

    # ---- query MLP layer 2 folded into HypergraphConv-1 input projection -----
    # (h @ qw2 + qb2) @ h1_w == h @ (qw2 @ h1_w) + (qb2 @ h1_w)
    xw1 = dot(h, qw2h1w_ref[...]) + qb2h1w_ref[...]          # (N, H)

    # ---- HypergraphConv 1 + ReLU ---------------------------------------------
    x1 = jnp.maximum(hconv(xw1, h1b_ref[...]), 0.0)          # (N, H) f32

    # ---- RGCN (mean aggr): one full-128-lane weight matmul, no lane concat ---
    # xw_all = x1 @ hstack(W_0, ..., W_{R-1}, W_root)  -> (N, (R+1)*H)
    xw_all = dot(x1, rw_ref[...])
    acc = xw_all[:, num_rel * hidden:] + rb_ref[...]         # root term + bias
    for r in range(num_rel):
        xw_r = xw_all[:, r * hidden:(r + 1) * hidden].astype(jnp.bfloat16)
        acc = acc + dot(a_ref[r], xw_r)                      # bf16 MXU, f32 acc
    x2 = jnp.maximum(acc, 0.0)                               # (N, H)

    # ---- HypergraphConv 2 + ReLU ---------------------------------------------
    xw2 = dot(x2, h2w_ref[...])
    x3 = jnp.maximum(hconv(xw2, h2b_ref[...]), 0.0)          # (N, E)

    # ---- final Linear (dropout(p=0.5) is identity in inference mode) ---------
    out_ref[...] = dot(x3, linw_ref[...]) + linb_ref[...]


# -----------------------------------------------------------------------------
# Model: deterministic parameter init + JAX glue + forward wrapper
# -----------------------------------------------------------------------------

class Args:
    vocab_size = 64
    seq_length = 8
    emb_size = 32
    gnn_hidden_size = 32
    text_hidden_size = 32
    class_num = 3


def init_params(args, key):
    ks = jax.random.split(key, 16)

    def rnd(k, shape, scale=0.1):
        return (scale * jax.random.normal(k, shape)).astype(jnp.float32)

    p = {}
    p["src_emb"] = rnd(ks[0], (args.vocab_size, args.emb_size), 1.0)
    p["seg_emb"] = rnd(ks[1], (3, args.emb_size), 1.0)
    p["lit_w"] = (jnp.ones((args.seq_length,), jnp.float32)
                  + 0.1 * jax.random.normal(ks[2], (args.seq_length,))).astype(jnp.float32)
    # query_mlp
    p["q_w1"] = rnd(ks[3], (args.emb_size, args.text_hidden_size))
    p["q_b1"] = rnd(ks[4], (1, args.text_hidden_size))
    p["q_w2"] = rnd(ks[5], (args.text_hidden_size, args.emb_size))
    p["q_b2"] = rnd(ks[6], (1, args.emb_size))
    # h_conv1: emb -> gnn_hidden
    p["h1_w"] = rnd(ks[7], (args.emb_size, args.gnn_hidden_size))
    p["h1_b"] = rnd(ks[8], (1, args.gnn_hidden_size))
    # r_conv: gnn_hidden -> gnn_hidden, R relations
    p["r_w"] = rnd(ks[9], (args.class_num, args.gnn_hidden_size, args.gnn_hidden_size))
    p["r_wroot"] = rnd(ks[10], (args.gnn_hidden_size, args.gnn_hidden_size))
    p["r_b"] = rnd(ks[11], (1, args.gnn_hidden_size))
    # h_conv2: gnn_hidden -> emb
    p["h2_w"] = rnd(ks[12], (args.gnn_hidden_size, args.emb_size))
    p["h2_b"] = rnd(ks[13], (1, args.emb_size))
    # final linear: emb -> emb
    p["lin_w"] = rnd(ks[14], (args.emb_size, args.emb_size))
    p["lin_b"] = rnd(ks[15], (1, args.emb_size))
    return p


def _densify_hypergraph(hyper_index, num_nodes, num_hyperedges):
    node_oh = jax.nn.one_hot(hyper_index[0], num_nodes, dtype=jnp.float32)       # (C, N)
    edge_oh = jax.nn.one_hot(hyper_index[1], num_hyperedges, dtype=jnp.float32)  # (C, M)
    H = node_oh.T @ edge_oh                                                      # (N, M)
    D = jnp.sum(H, axis=1)                                                       # node degree
    B = jnp.sum(H, axis=0)                                                       # hyperedge degree
    Dinv = jnp.where(D > 0, 1.0 / D, 0.0)
    Binv = jnp.where(B > 0, 1.0 / B, 0.0)
    Hd = Dinv[:, None] * H          # (N, M)
    He = Binv[:, None] * H.T        # (M, N)
    return Hd, He


def _densify_rgcn(edge_index, edge_type, num_nodes, num_relations):
    src_oh = jax.nn.one_hot(edge_index[0], num_nodes, dtype=jnp.float32)      # (E, N)
    tgt_oh = jax.nn.one_hot(edge_index[1], num_nodes, dtype=jnp.float32)      # (E, N)
    rel_oh = jax.nn.one_hot(edge_type, num_relations, dtype=jnp.float32)      # (E, R)
    A_count = jnp.einsum("er,ei,ej->rij", rel_oh, tgt_oh, src_oh)             # (R, N, N)
    deg = jnp.sum(A_count, axis=2, keepdims=True)                             # (R, N, 1)
    A_norm = jnp.where(deg > 0, A_count / jnp.maximum(deg, 1.0), 0.0)         # mean aggr
    return A_norm


def _pick_vmem_limit_bytes():
    """Per-generation VMEM request: ~80% of physical, capped at 100 MiB.

    v7x (64 MiB/core) -> ~51 MiB (leaves Mosaic scratch headroom);
    v5e/v6e (128 MiB) -> 100 MiB (more room for larger untiled N).
    """
    cap = None
    try:
        cap = int(getattr(pltpu.get_tpu_info(), "vmem_capacity_bytes", 0)) or None
    except Exception:
        cap = None
    if cap is None:
        cap = 128 * 1024 * 1024
    return min(int(cap * 0.8), 100 * 1024 * 1024)


def hcitengl_forward(params, args, src, seg, edge_index, hyper_index, edge_type,
                     num_hyperedges):
    N = src.shape[0]
    E, L = args.emb_size, args.seq_length
    H, R = args.gnn_hidden_size, args.class_num

    # --- glue: embedding gathers; PyTorch `.view(-1, E, L)` is a pure memory
    #     reinterpretation of the contiguous (N, L, E) tensor -> flat (N, E*L),
    #     flat index i maps to view coords (e, l) = (i // L, i % L).
    srcv = jnp.reshape(params["src_emb"][src], (N, E * L))
    segv = jnp.reshape(params["seg_emb"][seg], (N, E * L))
    wflat = jnp.reshape(jnp.tile(params["lit_w"], E), (1, E * L))  # w[i % L]

    # --- static 0/1 selector matrices for the lane-dense literature embedding
    idx = jnp.arange(E * L)
    sel = (idx[:, None] % L == jnp.arange(L)[None, :]).astype(jnp.float32)      # (E*L, L)
    selT = sel.T                                                                 # (L, E*L)
    sumsel = (idx[:, None] // L == jnp.arange(E)[None, :]).astype(jnp.float32)   # (E*L, E)

    # --- constant folds (free algebra, removes two narrow MXU passes):
    sumsel_qw1 = sumsel @ params["q_w1"]                     # (E*L, T)
    qw2h1w = params["q_w2"] @ params["h1_w"]                 # (T, H)
    qb2h1w = params["q_b2"] @ params["h1_w"]                 # (1, H)

    # --- glue: densify graph structure and cast the big slabs to bf16 so the
    #     DMA'd bytes / VMEM footprint are halved (accumulation stays f32).
    # TODO(synk): beyond a few thousand nodes, split into a node-local call plus
    # row-tiled graph-mixing calls (BlockSpec-streamed A/Hd/He with a "parallel"
    # row axis for v7x's two TensorCores), or switch to a scalar-prefetch
    # edge-list gather path; the dense all-in-VMEM slab stops fitting there.
    Hd, He = _densify_hypergraph(hyper_index, N, num_hyperedges)
    A = _densify_rgcn(edge_index, edge_type, N, R)
    Hd = Hd.astype(jnp.bfloat16)
    He = He.astype(jnp.bfloat16)
    A = A.astype(jnp.bfloat16)

    # --- hstacked RGCN weight: [W_0 | ... | W_{R-1} | W_root] -> (H, (R+1)*H)
    rw_hstack = jnp.concatenate(
        [params["r_w"][r] for r in range(R)] + [params["r_wroot"]], axis=1)

    operands = (
        srcv, segv, wflat, sel, selT, sumsel_qw1,
        params["q_b1"], qw2h1w, qb2h1w,
        params["h1_b"], params["h2_w"], params["h2_b"],
        Hd, He, A, rw_hstack, params["r_b"],
        params["lin_w"], params["lin_b"],
    )

    out = pl.pallas_call(
        functools.partial(_fused_hcitengl_kernel, num_rel=R, hidden=H),
        out_shape=jax.ShapeDtypeStruct((N, E), jnp.float32),
        in_specs=[pl.BlockSpec(memory_space=pltpu.MemorySpace.VMEM)] * len(operands),
        out_specs=pl.BlockSpec(memory_space=pltpu.MemorySpace.VMEM),
        compiler_params=pltpu.CompilerParams(
            vmem_limit_bytes=_pick_vmem_limit_bytes()),
    )(*operands)

    # TODO(synk): dropout(p=0.5) is applied in inference mode (identity); the
    # train-mode stochastic mask is not bit-reproducible against PyTorch RNG.
    return out


# -----------------------------------------------------------------------------
# Demo
# -----------------------------------------------------------------------------

if __name__ == "__main__":
    args = Args()
    key = jax.random.PRNGKey(0)
    k_param, k_src, k_seg, k_ei, k_et, k_hi = jax.random.split(key, 6)

    params = init_params(args, k_param)

    N_NODES = 8          # batch of literature nodes
    N_EDGES = 16
    N_HYPER_CONN = 16
    N_HYPEREDGES = 4

    src = jax.random.randint(k_src, (N_NODES, args.seq_length), 0,
                             args.vocab_size, dtype=jnp.int32)
    seg = jax.random.randint(k_seg, (N_NODES, args.seq_length), 0, 3,
                             dtype=jnp.int32)
    edge_index = jax.random.randint(k_ei, (2, N_EDGES), 0, N_NODES,
                                    dtype=jnp.int32)
    edge_type = jax.random.randint(k_et, (N_EDGES,), 0, args.class_num,
                                   dtype=jnp.int32)
    hyper_nodes = jax.random.randint(k_hi, (N_HYPER_CONN,), 0, N_NODES,
                                     dtype=jnp.int32)
    hyper_edges = jnp.arange(N_HYPER_CONN, dtype=jnp.int32) % N_HYPEREDGES
    hyper_index = jnp.stack([hyper_nodes, hyper_edges], axis=0)

    out = hcitengl_forward(params, args, src, seg, edge_index, hyper_index,
                           edge_type, N_HYPEREDGES)
    out = jax.block_until_ready(out)
    assert out.shape == (N_NODES, args.emb_size)
    assert bool(jnp.all(jnp.isfinite(out)))
    print("KERNEL_OK")
</pallas_src>

<mosaic_0001>
module attributes {stable_mosaic.version = 11 : i64} {
  func.func @_fused_hcitengl_kernel(%arg0: memref<8x256xf32, #tpu.memory_space<vmem>>, %arg1: memref<8x256xf32, #tpu.memory_space<vmem>>, %arg2: memref<1x256xf32, #tpu.memory_space<vmem>>, %arg3: memref<256x8xf32, #tpu.memory_space<vmem>>, %arg4: memref<8x256xf32, #tpu.memory_space<vmem>>, %arg5: memref<256x32xf32, #tpu.memory_space<vmem>>, %arg6: memref<1x32xf32, #tpu.memory_space<vmem>>, %arg7: memref<32x32xf32, #tpu.memory_space<vmem>>, %arg8: memref<1x32xf32, #tpu.memory_space<vmem>>, %arg9: memref<1x32xf32, #tpu.memory_space<vmem>>, %arg10: memref<32x32xf32, #tpu.memory_space<vmem>>, %arg11: memref<1x32xf32, #tpu.memory_space<vmem>>, %arg12: memref<8x4xbf16, #tpu.memory_space<vmem>>, %arg13: memref<4x8xbf16, #tpu.memory_space<vmem>>, %arg14: memref<3x8x8xbf16, #tpu.memory_space<vmem>>, %arg15: memref<32x128xf32, #tpu.memory_space<vmem>>, %arg16: memref<1x32xf32, #tpu.memory_space<vmem>>, %arg17: memref<32x32xf32, #tpu.memory_space<vmem>>, %arg18: memref<1x32xf32, #tpu.memory_space<vmem>>, %arg19: memref<8x32xf32, #tpu.memory_space<vmem>>) attributes {dimension_semantics = [], scalar_prefetch = 0 : i64, scratch_operands = 0 : i64, tpu.core_type = #tpu.core_type<tc>} {
    %c0 = arith.constant 0 : index
    %c0_0 = arith.constant 0 : index
    %0 = vector.load %arg0[%c0, %c0_0] : memref<8x256xf32, #tpu.memory_space<vmem>>, vector<8x256xf32>
    %c0_1 = arith.constant 0 : index
    %c0_2 = arith.constant 0 : index
    %1 = vector.load %arg2[%c0_1, %c0_2] : memref<1x256xf32, #tpu.memory_space<vmem>>, vector<1x256xf32>
    %2 = vector.broadcast %1 : vector<1x256xf32> to vector<8x256xf32>
    %3 = arith.mulf %0, %2 : vector<8x256xf32>
    %c0_3 = arith.constant 0 : index
    %c0_4 = arith.constant 0 : index
    %4 = vector.load %arg1[%c0_3, %c0_4] : memref<8x256xf32, #tpu.memory_space<vmem>>, vector<8x256xf32>
    %5 = arith.mulf %3, %3 : vector<8x256xf32>
    %c0_5 = arith.constant 0 : index
    %c0_6 = arith.constant 0 : index
    %6 = vector.load %arg3[%c0_5, %c0_6] : memref<256x8xf32, #tpu.memory_space<vmem>>, vector<256x8xf32>
    %cst = arith.constant dense<0.000000e+00> : vector<8x8xf32>
    %7 = tpu.matmul %5, %6, %cst {dimension_numbers = #tpu.dot_dimension_numbers<[1], [0], [0], [1], [0, 0, 1, 1], [], []>} : vector<8x256xf32>, vector<256x8xf32>, vector<8x8xf32> -> vector<8x8xf32>
    %cst_7 = arith.constant 1.000000e-24 : f32
    %8 = vector.broadcast %cst_7 : f32 to vector<8x8xf32>
    %9 = arith.maximumf %7, %8 : vector<8x8xf32>
    %10 = math.rsqrt %9 : vector<8x8xf32>
    %11 = arith.mulf %4, %4 : vector<8x256xf32>
    %c0_8 = arith.constant 0 : index
    %c0_9 = arith.constant 0 : index
    %12 = vector.load %arg3[%c0_8, %c0_9] : memref<256x8xf32, #tpu.memory_space<vmem>>, vector<256x8xf32>
    %cst_10 = arith.constant dense<0.000000e+00> : vector<8x8xf32>
    %13 = tpu.matmul %11, %12, %cst_10 {dimension_numbers = #tpu.dot_dimension_numbers<[1], [0], [0], [1], [0, 0, 1, 1], [], []>} : vector<8x256xf32>, vector<256x8xf32>, vector<8x8xf32> -> vector<8x8xf32>
    %cst_11 = arith.constant 1.000000e-24 : f32
    %14 = vector.broadcast %cst_11 : f32 to vector<8x8xf32>
    %15 = arith.maximumf %13, %14 : vector<8x8xf32>
    %16 = math.rsqrt %15 : vector<8x8xf32>
    %c0_12 = arith.constant 0 : index
    %c0_13 = arith.constant 0 : index
    %17 = vector.load %arg4[%c0_12, %c0_13] : memref<8x256xf32, #tpu.memory_space<vmem>>, vector<8x256xf32>
    %cst_14 = arith.constant dense<0.000000e+00> : vector<8x256xf32>
    %18 = tpu.matmul %10, %17, %cst_14 {dimension_numbers = #tpu.dot_dimension_numbers<[1], [0], [0], [1], [0, 0, 1, 1], [], []>} : vector<8x8xf32>, vector<8x256xf32>, vector<8x256xf32> -> vector<8x256xf32>
    %19 = arith.mulf %3, %18 : vector<8x256xf32>
    %c0_15 = arith.constant 0 : index
    %c0_16 = arith.constant 0 : index
    %20 = vector.load %arg4[%c0_15, %c0_16] : memref<8x256xf32, #tpu.memory_space<vmem>>, vector<8x256xf32>
    %cst_17 = arith.constant dense<0.000000e+00> : vector<8x256xf32>
    %21 = tpu.matmul %16, %20, %cst_17 {dimension_numbers = #tpu.dot_dimension_numbers<[1], [0], [0], [1], [0, 0, 1, 1], [], []>} : vector<8x8xf32>, vector<8x256xf32>, vector<8x256xf32> -> vector<8x256xf32>
    %22 = arith.mulf %4, %21 : vector<8x256xf32>
    %23 = arith.addf %19, %22 : vector<8x256xf32>
    %c0_18 = arith.constant 0 : index
    %c0_19 = arith.constant 0 : index
    %24 = vector.load %arg5[%c0_18, %c0_19] : memref<256x32xf32, #tpu.memory_space<vmem>>, vector<256x32xf32>
    %cst_20 = arith.constant dense<0.000000e+00> : vector<8x32xf32>
    %25 = tpu.matmul %23, %24, %cst_20 {dimension_numbers = #tpu.dot_dimension_numbers<[1], [0], [0], [1], [0, 0, 1, 1], [], []>} : vector<8x256xf32>, vector<256x32xf32>, vector<8x32xf32> -> vector<8x32xf32>
    %c0_21 = arith.constant 0 : index
    %c0_22 = arith.constant 0 : index
    %26 = vector.load %arg6[%c0_21, %c0_22] : memref<1x32xf32, #tpu.memory_space<vmem>>, vector<1x32xf32>
    %27 = vector.broadcast %26 : vector<1x32xf32> to vector<8x32xf32>
    %28 = arith.addf %25, %27 : vector<8x32xf32>
    %cst_23 = arith.constant 0.000000e+00 : f32
    %29 = vector.broadcast %cst_23 : f32 to vector<8x32xf32>
    %30 = arith.maximumf %28, %29 : vector<8x32xf32>
    %c0_24 = arith.constant 0 : index
    %c0_25 = arith.constant 0 : index
    %31 = vector.load %arg7[%c0_24, %c0_25] : memref<32x32xf32, #tpu.memory_space<vmem>>, vector<32x32xf32>
    %cst_26 = arith.constant dense<0.000000e+00> : vector<8x32xf32>
    %32 = tpu.matmul %30, %31, %cst_26 {dimension_numbers = #tpu.dot_dimension_numbers<[1], [0], [0], [1], [0, 0, 1, 1], [], []>} : vector<8x32xf32>, vector<32x32xf32>, vector<8x32xf32> -> vector<8x32xf32>
    %c0_27 = arith.constant 0 : index
    %c0_28 = arith.constant 0 : index
    %33 = vector.load %arg8[%c0_27, %c0_28] : memref<1x32xf32, #tpu.memory_space<vmem>>, vector<1x32xf32>
    %34 = vector.broadcast %33 : vector<1x32xf32> to vector<8x32xf32>
    %35 = arith.addf %32, %34 : vector<8x32xf32>
    %c0_29 = arith.constant 0 : index
    %c0_30 = arith.constant 0 : index
    %36 = vector.load %arg9[%c0_29, %c0_30] : memref<1x32xf32, #tpu.memory_space<vmem>>, vector<1x32xf32>
    %c0_31 = arith.constant 0 : index
    %c0_32 = arith.constant 0 : index
    %37 = vector.load %arg13[%c0_31, %c0_32] : memref<4x8xbf16, #tpu.memory_space<vmem>>, vector<4x8xbf16>
    %38 = arith.truncf %35 : vector<8x32xf32> to vector<8x32xbf16>
    %cst_33 = arith.constant dense<0.000000e+00> : vector<4x32xf32>
    %39 = tpu.matmul %37, %38, %cst_33 {dimension_numbers = #tpu.dot_dimension_numbers<[1], [0], [0], [1], [0, 0, 1, 1], [], []>} : vector<4x8xbf16>, vector<8x32xbf16>, vector<4x32xf32> -> vector<4x32xf32>
    %c0_34 = arith.constant 0 : index
    %c0_35 = arith.constant 0 : index
    %40 = vector.load %arg12[%c0_34, %c0_35] : memref<8x4xbf16, #tpu.memory_space<vmem>>, vector<8x4xbf16>
    %41 = arith.truncf %39 : vector<4x32xf32> to vector<4x32xbf16>
    %cst_36 = arith.constant dense<0.000000e+00> : vector<8x32xf32>
    %42 = tpu.matmul %40, %41, %cst_36 {dimension_numbers = #tpu.dot_dimension_numbers<[1], [0], [0], [1], [0, 0, 1, 1], [], []>} : vector<8x4xbf16>, vector<4x32xbf16>, vector<8x32xf32> -> vector<8x32xf32>
    %43 = vector.broadcast %36 : vector<1x32xf32> to vector<8x32xf32>
    %44 = arith.addf %42, %43 : vector<8x32xf32>
    %cst_37 = arith.constant 0.000000e+00 : f32
    %45 = vector.broadcast %cst_37 : f32 to vector<8x32xf32>
    %46 = arith.maximumf %44, %45 : vector<8x32xf32>
    %c0_38 = arith.constant 0 : index
    %c0_39 = arith.constant 0 : index
    %47 = vector.load %arg15[%c0_38, %c0_39] : memref<32x128xf32, #tpu.memory_space<vmem>>, vector<32x128xf32>
    %cst_40 = arith.constant dense<0.000000e+00> : vector<8x128xf32>
    %48 = tpu.matmul %46, %47, %cst_40 {dimension_numbers = #tpu.dot_dimension_numbers<[1], [0], [0], [1], [0, 0, 1, 1], [], []>} : vector<8x32xf32>, vector<32x128xf32>, vector<8x128xf32> -> vector<8x128xf32>
    %49 = vector.extract_strided_slice %48 {offsets = [0, 96], sizes = [8, 32], strides = [1, 1]} : vector<8x128xf32> to vector<8x32xf32>
    %c0_41 = arith.constant 0 : index
    %c0_42 = arith.constant 0 : index
    %50 = vector.load %arg16[%c0_41, %c0_42] : memref<1x32xf32, #tpu.memory_space<vmem>>, vector<1x32xf32>
    %51 = vector.broadcast %50 : vector<1x32xf32> to vector<8x32xf32>
    %52 = arith.addf %49, %51 : vector<8x32xf32>
    %53 = vector.extract_strided_slice %48 {offsets = [0, 0], sizes = [8, 32], strides = [1, 1]} : vector<8x128xf32> to vector<8x32xf32>
    %54 = arith.truncf %53 : vector<8x32xf32> to vector<8x32xbf16>
    %c0_43 = arith.constant 0 : index
    %c0_44 = arith.constant 0 : index
    %c0_45 = arith.constant 0 : index
    %55 = vector.load %arg14[%c0_43, %c0_44, %c0_45] : memref<3x8x8xbf16, #tpu.memory_space<vmem>>, vector<1x8x8xbf16>
    %56 = vector.shape_cast %55 : vector<1x8x8xbf16> to vector<8x8xbf16>
    %cst_46 = arith.constant dense<0.000000e+00> : vector<8x32xf32>
    %57 = tpu.matmul %56, %54, %cst_46 {dimension_numbers = #tpu.dot_dimension_numbers<[1], [0], [0], [1], [0, 0, 1, 1], [], []>} : vector<8x8xbf16>, vector<8x32xbf16>, vector<8x32xf32> -> vector<8x32xf32>
    %58 = arith.addf %52, %57 : vector<8x32xf32>
    %59 = vector.extract_strided_slice %48 {offsets = [0, 32], sizes = [8, 32], strides = [1, 1]} : vector<8x128xf32> to vector<8x32xf32>
    %60 = arith.truncf %59 : vector<8x32xf32> to vector<8x32xbf16>
    %c1 = arith.constant 1 : index
    %c0_47 = arith.constant 0 : index
    %c0_48 = arith.constant 0 : index
    %61 = vector.load %arg14[%c1, %c0_47, %c0_48] : memref<3x8x8xbf16, #tpu.memory_space<vmem>>, vector<1x8x8xbf16>
    %62 = vector.shape_cast %61 : vector<1x8x8xbf16> to vector<8x8xbf16>
    %cst_49 = arith.constant dense<0.000000e+00> : vector<8x32xf32>
    %63 = tpu.matmul %62, %60, %cst_49 {dimension_numbers = #tpu.dot_dimension_numbers<[1], [0], [0], [1], [0, 0, 1, 1], [], []>} : vector<8x8xbf16>, vector<8x32xbf16>, vector<8x32xf32> -> vector<8x32xf32>
    %64 = arith.addf %58, %63 : vector<8x32xf32>
    %65 = vector.extract_strided_slice %48 {offsets = [0, 64], sizes = [8, 32], strides = [1, 1]} : vector<8x128xf32> to vector<8x32xf32>
    %66 = arith.truncf %65 : vector<8x32xf32> to vector<8x32xbf16>
    %c2 = arith.constant 2 : index
    %c0_50 = arith.constant 0 : index
    %c0_51 = arith.constant 0 : index
    %67 = vector.load %arg14[%c2, %c0_50, %c0_51] : memref<3x8x8xbf16, #tpu.memory_space<vmem>>, vector<1x8x8xbf16>
    %68 = vector.shape_cast %67 : vector<1x8x8xbf16> to vector<8x8xbf16>
    %cst_52 = arith.constant dense<0.000000e+00> : vector<8x32xf32>
    %69 = tpu.matmul %68, %66, %cst_52 {dimension_numbers = #tpu.dot_dimension_numbers<[1], [0], [0], [1], [0, 0, 1, 1], [], []>} : vector<8x8xbf16>, vector<8x32xbf16>, vector<8x32xf32> -> vector<8x32xf32>
    %70 = arith.addf %64, %69 : vector<8x32xf32>
    %cst_53 = arith.constant 0.000000e+00 : f32
    %71 = vector.broadcast %cst_53 : f32 to vector<8x32xf32>
    %72 = arith.maximumf %70, %71 : vector<8x32xf32>
    %c0_54 = arith.constant 0 : index
    %c0_55 = arith.constant 0 : index
    %73 = vector.load %arg10[%c0_54, %c0_55] : memref<32x32xf32, #tpu.memory_space<vmem>>, vector<32x32xf32>
    %cst_56 = arith.constant dense<0.000000e+00> : vector<8x32xf32>
    %74 = tpu.matmul %72, %73, %cst_56 {dimension_numbers = #tpu.dot_dimension_numbers<[1], [0], [0], [1], [0, 0, 1, 1], [], []>} : vector<8x32xf32>, vector<32x32xf32>, vector<8x32xf32> -> vector<8x32xf32>
    %c0_57 = arith.constant 0 : index
    %c0_58 = arith.constant 0 : index
    %75 = vector.load %arg11[%c0_57, %c0_58] : memref<1x32xf32, #tpu.memory_space<vmem>>, vector<1x32xf32>
    %c0_59 = arith.constant 0 : index
    %c0_60 = arith.constant 0 : index
    %76 = vector.load %arg13[%c0_59, %c0_60] : memref<4x8xbf16, #tpu.memory_space<vmem>>, vector<4x8xbf16>
    %77 = arith.truncf %74 : vector<8x32xf32> to vector<8x32xbf16>
    %cst_61 = arith.constant dense<0.000000e+00> : vector<4x32xf32>
    %78 = tpu.matmul %76, %77, %cst_61 {dimension_numbers = #tpu.dot_dimension_numbers<[1], [0], [0], [1], [0, 0, 1, 1], [], []>} : vector<4x8xbf16>, vector<8x32xbf16>, vector<4x32xf32> -> vector<4x32xf32>
    %c0_62 = arith.constant 0 : index
    %c0_63 = arith.constant 0 : index
    %79 = vector.load %arg12[%c0_62, %c0_63] : memref<8x4xbf16, #tpu.memory_space<vmem>>, vector<8x4xbf16>
    %80 = arith.truncf %78 : vector<4x32xf32> to vector<4x32xbf16>
    %cst_64 = arith.constant dense<0.000000e+00> : vector<8x32xf32>
    %81 = tpu.matmul %79, %80, %cst_64 {dimension_numbers = #tpu.dot_dimension_numbers<[1], [0], [0], [1], [0, 0, 1, 1], [], []>} : vector<8x4xbf16>, vector<4x32xbf16>, vector<8x32xf32> -> vector<8x32xf32>
    %82 = vector.broadcast %75 : vector<1x32xf32> to vector<8x32xf32>
    %83 = arith.addf %81, %82 : vector<8x32xf32>
    %cst_65 = arith.constant 0.000000e+00 : f32
    %84 = vector.broadcast %cst_65 : f32 to vector<8x32xf32>
    %85 = arith.maximumf %83, %84 : vector<8x32xf32>
    %c0_66 = arith.constant 0 : index
    %c0_67 = arith.constant 0 : index
    %86 = vector.load %arg17[%c0_66, %c0_67] : memref<32x32xf32, #tpu.memory_space<vmem>>, vector<32x32xf32>
    %cst_68 = arith.constant dense<0.000000e+00> : vector<8x32xf32>
    %87 = tpu.matmul %85, %86, %cst_68 {dimension_numbers = #tpu.dot_dimension_numbers<[1], [0], [0], [1], [0, 0, 1, 1], [], []>} : vector<8x32xf32>, vector<32x32xf32>, vector<8x32xf32> -> vector<8x32xf32>
    %c0_69 = arith.constant 0 : index
    %c0_70 = arith.constant 0 : index
    %88 = vector.load %arg18[%c0_69, %c0_70] : memref<1x32xf32, #tpu.memory_space<vmem>>, vector<1x32xf32>
    %89 = vector.broadcast %88 : vector<1x32xf32> to vector<8x32xf32>
    %90 = arith.addf %87, %89 : vector<8x32xf32>
    %c0_71 = arith.constant 0 : index
    %c0_72 = arith.constant 0 : index
    %91 = vector.load %arg19[%c0_71, %c0_72] : memref<8x32xf32, #tpu.memory_space<vmem>>, vector<8x32xf32>
    tpu.vector_store %arg19[%c0_71, %c0_72], %90 {strides = array<i32>} : memref<8x32xf32, #tpu.memory_space<vmem>>, vector<8x32xf32>,
    return
  }
}

</mosaic_0001>

<bundles_post_ra>
// kernel: tpu_custom_call.1
= control target key start
LH: loop header
LB: loop body
LE: loop exit
PB: predicated region body
PF: predicated region fallthrough
CT: control target
= control target key end

     0   :  { %s2853_s0 = inlined_call_operand.hbm [shape: f32[8,256], index: 0, kind: input, shape index: {}]   ;;  %s2854_s1 = inlined_call_operand.hbm [shape: f32[8,256], index: 1, kind: input, shape index: {}]   ;;  %s2855_s2 = inlined_call_operand.hbm [shape: f32[1,256], index: 2, kind: input, shape index: {}]   ;;  %s2856_s3 = inlined_call_operand.hbm [shape: f32[256,8], index: 3, kind: input, shape index: {}]   ;;  %s2857_s4 = inlined_call_operand.hbm [shape: f32[8,256], index: 4, kind: input, shape index: {}]   ;;  %s2858_s5 = inlined_call_operand.hbm [shape: f32[256,32], index: 5, kind: input, shape index: {}]   ;;  %s2859_s6 = inlined_call_operand.hbm [shape: f32[1,32], index: 6, kind: input, shape index: {}]   ;;  %s2860_s7 = inlined_call_operand.hbm [shape: f32[32,32], index: 7, kind: input, shape index: {}]   ;;  %s2861_s8 = inlined_call_operand.hbm [shape: f32[1,32], index: 8, kind: input, shape index: {}]   ;;  %s2862_s9 = inlined_call_operand.hbm [shape: f32[1,32], index: 9, kind: input, shape index: {}]   ;;  %s2863_s10 = inlined_call_operand.hbm [shape: f32[32,32], index: 10, kind: input, shape index: {}]   ;;  %s2864_s11 = inlined_call_operand.hbm [shape: f32[1,32], index: 11, kind: input, shape index: {}]   ;;  %s2865_s12 = inlined_call_operand.hbm [shape: bf16[8,4], index: 12, kind: input, shape index: {}]   ;;  %s2866_s13 = inlined_call_operand.hbm [shape: bf16[4,8], index: 13, kind: input, shape index: {}]   ;;  %s2867_s14 = inlined_call_operand.hbm [shape: bf16[3,8,8], index: 14, kind: input, shape index: {}]   ;;  %s2868_s15 = inlined_call_operand.hbm [shape: f32[32,128], index: 15, kind: input, shape index: {}]   ;;  %s2869_s16 = inlined_call_operand.hbm [shape: f32[1,32], index: 16, kind: input, shape index: {}]   ;;  %s2870_s17 = inlined_call_operand.hbm [shape: f32[32,32], index: 17, kind: input, shape index: {}]   ;;  %s2871_s18 = inlined_call_operand.hbm [shape: f32[1,32], index: 18, kind: input, shape index: {}]   ;;  %s2872_s19 = inlined_call_operand.hbm [shape: f32[8,32], index: 19, kind: output, shape index: {}]  }
   0x1   :  { %2879 = sst [smem:[#allocation44_spill]] %s2853_s0 }
   0x2   :  { %2880 = sst [smem:[#allocation45_spill]] %s2854_s1 }
   0x3   :  { %2881 = sst [smem:[#allocation46_spill]] %s2855_s2 }
   0x4   :  { %2882 = sst [smem:[#allocation47_spill]] %s2856_s3 }
   0x5   :  { %2883 = sst [smem:[#allocation48_spill]] %s2871_s18 }
   0x6   :  { %2884 = sst [smem:[#allocation49_spill]] %s2872_s19 }
   0x7   :  { %24 = vsyncpa [#allocation3], 0 }
   0x8   :  { %25 = vsyncpa [#allocation6], 0 }
   0x9   :  { %26 = vsyncpa [#allocation9], 0 }
   0xa   :  { %27 = vsyncpa [#allocation12], 0 }
   0xb   :  { %28 = vsyncpa [#allocation15], 0 }
   0xc   :  { %29 = vsyncpa [#allocation18], 0 }
   0xd   :  { %30 = vsyncpa [#allocation21], 0 }
   0xe   :  { %31 = vsyncpa [#allocation24], 0 }
   0xf   :  { %32 = vsyncpa [#allocation27], 0 }
  0x10   :  { %33 = vsyncpa [#allocation30], 0 }
  0x11   :  { %34 = vsyncpa [#allocation4], 0  ;;  %s2349_s0 = smov [#allocation5]   ;;  %s2350_s20 = smov [#allocation8]  }
  0x12   :  { %s51_s30 = sshll.u32 %s2349_s0, 4  ;;  %s70_s21 = sshll.u32 %s2350_s20, 4  ;;  %s52_s30 = int_to_ptr.vmem [resolvable:$true] %s51_s30  ;;  %s2478_s21 = int_to_ptr.vmem [resolvable:$true] %s70_s21 }
  0x13   :  { %s2885_s2 = sld [smem:[#allocation45_spill]] }
  0x19   :  { %s1887_s23 = scalar_lea.hbm %s2885_s2, 256 }
  0x1a   :  { %p1888_p0 = scmp.ne.s32.totalorder %s2885_s2, %s1887_s23  ;;  %p1891_p1 = scmp.lt.u32.totalorder %s1887_s23, %s2885_s2 }
  0x1c   :  { %p1893_p2 = pnand %p1891_p1, %p1888_p0 }
  0x1e   :  { %1896 = shalt.err (!%p1893_p2)
}
  0x1f   :  { %s1897_s27 = scalar_lea.vmem %s52_s30, 256  ;;  %p1902_p4 = scmp.lt.s32.totalorder %s52_s30, %s52_s30 }
  0x20   :  { %p1898_p3 = scmp.ne.s32.totalorder %s52_s30, %s1897_s27  ;;  %p1903_p5 = scmp.lt.s32.totalorder %s1897_s27, %s1897_s27 }
  0x22   :  { %p1904_p6 = por %p1903_p5, %p1902_p4 }
  0x24   :  { %p1905_p7 = pnand %p1904_p6, %p1898_p3 }
  0x26   :  { %1908 = shalt.err (!%p1905_p7)
}
  0x27   :  { %54 = dma.hbm_to_vmem [thread:$0]  %s2885_s2, 256, %s52_s30, [#allocation6]  }
  0x28   :  { %s2886_s1 = sld [smem:[#allocation47_spill]] }
  0x2e   :  { %s1909_s22 = scalar_lea.hbm %s2886_s1, 4096 }
  0x2f   :  { %p1910_p8 = scmp.ne.s32.totalorder %s2886_s1, %s1909_s22  ;;  %p1913_p9 = scmp.lt.u32.totalorder %s1909_s22, %s2886_s1 }
  0x31   :  { %p1915_p10 = pnand %p1913_p9, %p1910_p8 }
  0x33   :  { %1918 = shalt.err (!%p1915_p10)
}
  0x34   :  { %s1919_s26 = scalar_lea.vmem %s2478_s21, 4096  ;;  %p1924_p12 = scmp.lt.s32.totalorder %s2478_s21, %s2478_s21 }
  0x35   :  { %p1920_p11 = scmp.ne.s32.totalorder %s2478_s21, %s1919_s26  ;;  %p1925_p13 = scmp.lt.s32.totalorder %s1919_s26, %s1919_s26 }
  0x37   :  { %p1926_p0 = por %p1925_p13, %p1924_p12 }
  0x39   :  { %p1927_p1 = pnand %p1926_p0, %p1920_p11 }
  0x3b   :  { %1930 = shalt.err (!%p1927_p1)
}
  0x3c   :  { %s2351_s30 = smov 128   ;;  %s2352_s2 = smov 8  }
  0x3d   :  { %76 = dma.hbm_to_vmem [thread:$0]  %s2886_s1, 4096, %s2478_s21, [#allocation9], %s2351_s30, %s2351_s30, %s2352_s2  }
  0x3e   :  { %s2353_s29 = smov [#allocation11]   ;;  %s2354_s20 = smov [#allocation14]  }
  0x3f   :  { %s92_s0 = sshll.u32 %s2353_s29, 4  ;;  %s114_s22 = sshll.u32 %s2354_s20, 4  ;;  %s93_s0 = int_to_ptr.vmem [resolvable:$true] %s92_s0  ;;  %s2512_s22 = int_to_ptr.vmem [resolvable:$true] %s114_s22 }
  0x40   :  { %s1931_s23 = scalar_lea.hbm %s2858_s5, 4096 }
  0x41   :  { %p1932_p2 = scmp.ne.s32.totalorder %s2858_s5, %s1931_s23  ;;  %p1935_p3 = scmp.lt.u32.totalorder %s1931_s23, %s2858_s5 }
  0x43   :  { %p1937_p4 = pnand %p1935_p3, %p1932_p2 }
  0x45   :  { %1940 = shalt.err (!%p1937_p4)
}
  0x46   :  { %s1941_s21 = scalar_lea.vmem %s93_s0, 4096  ;;  %p1946_p6 = scmp.lt.s32.totalorder %s93_s0, %s93_s0 }
  0x47   :  { %p1942_p5 = scmp.ne.s32.totalorder %s93_s0, %s1941_s21  ;;  %p1947_p7 = scmp.lt.s32.totalorder %s1941_s21, %s1941_s21 }
  0x49   :  { %p1948_p8 = por %p1947_p7, %p1946_p6 }
  0x4b   :  { %p1949_p9 = pnand %p1948_p8, %p1942_p5 }
  0x4d   :  { %1952 = shalt.err (!%p1949_p9)
}
  0x4e   :  { %98 = dma.hbm_to_vmem [thread:$0]  %s2858_s5, 4096, %s93_s0, [#allocation12], %s2351_s30, %s2351_s30, %s2352_s2  }
  0x4f   :  { %s1953_s18 = scalar_lea.hbm %s2860_s7, 512 }
  0x50   :  { %p1954_p10 = scmp.ne.s32.totalorder %s2860_s7, %s1953_s18  ;;  %p1957_p11 = scmp.lt.u32.totalorder %s1953_s18, %s2860_s7 }
  0x52   :  { %p1959_p12 = pnand %p1957_p11, %p1954_p10 }
  0x54   :  { %1962 = shalt.err (!%p1959_p12)
}
  0x55   :  { %s1963_s23 = scalar_lea.vmem %s2512_s22, 512  ;;  %p1968_p0 = scmp.lt.s32.totalorder %s2512_s22, %s2512_s22 }
  0x56   :  { %p1964_p13 = scmp.ne.s32.totalorder %s2512_s22, %s1963_s23  ;;  %p1969_p1 = scmp.lt.s32.totalorder %s1963_s23, %s1963_s23 }
  0x58   :  { %p1970_p2 = por %p1969_p1, %p1968_p0 }
  0x5a   :  { %p1971_p3 = pnand %p1970_p2, %p1964_p13 }
  0x5c   :  { %1974 = shalt.err (!%p1971_p3)
}
  0x5d   :  { %120 = dma.hbm_to_vmem [thread:$0]  %s2860_s7, 512, %s2512_s22, [#allocation15], %s2351_s30, %s2351_s30, %s2352_s2  }
  0x5e   :  { %s2355_s3 = smov [#allocation17]   ;;  %s2356_s21 = smov [#allocation20]  }
  0x5f   :  { %s137_s26 = sshll.u32 %s2355_s3, 4  ;;  %s159_s1 = sshll.u32 %s2356_s21, 4  ;;  %s138_s26 = int_to_ptr.vmem [resolvable:$true] %s137_s26  ;;  %s160_s1 = int_to_ptr.vmem [resolvable:$true] %s159_s1 }
  0x60   :  { %s1975_s29 = scalar_lea.hbm %s2862_s9, 16 }
  0x61   :  { %p1976_p4 = scmp.ne.s32.totalorder %s2862_s9, %s1975_s29  ;;  %p1979_p5 = scmp.lt.u32.totalorder %s1975_s29, %s2862_s9 }
  0x63   :  { %p1981_p6 = pnand %p1979_p5, %p1976_p4 }
  0x65   :  { %1984 = shalt.err (!%p1981_p6)
}
  0x66   :  { %s1985_s7 = scalar_lea.vmem %s138_s26, 16  ;;  %s1989_s22 = scalar_lea.vmem %s138_s26, 32 }
  0x67   :  { %p1986_p7 = scmp.ne.s32.totalorder %s138_s26, %s1985_s7  ;;  %p1990_p8 = scmp.lt.s32.totalorder %s138_s26, %s138_s26 }
  0x68   :  { %p1991_p9 = scmp.lt.s32.totalorder %s1989_s22, %s1985_s7 }
  0x6a   :  { %p1992_p10 = por %p1991_p9, %p1990_p8 }
  0x6c   :  { %p1993_p11 = pnand %p1992_p10, %p1986_p7 }
  0x6e   :  { %1996 = shalt.err (!%p1993_p11)
}
  0x6f   :  { %140 = dma.hbm_to_vmem [thread:$0]  %s2862_s9, 16, %s138_s26, [#allocation18]  }
  0x70   :  { %s1997_s3 = scalar_lea.hbm %s2864_s11, 16 }
  0x71   :  { %p1998_p12 = scmp.ne.s32.totalorder %s2864_s11, %s1997_s3  ;;  %p2001_p13 = scmp.lt.u32.totalorder %s1997_s3, %s2864_s11 }
  0x73   :  { %p2003_p0 = pnand %p2001_p13, %p1998_p12 }
  0x75   :  { %2006 = shalt.err (!%p2003_p0)
}
  0x76   :  { %s2007_s18 = scalar_lea.vmem %s160_s1, 16  ;;  %s2011_s19 = scalar_lea.vmem %s160_s1, 32 }
  0x77   :  { %p2008_p1 = scmp.ne.s32.totalorder %s160_s1, %s2007_s18  ;;  %p2012_p2 = scmp.lt.s32.totalorder %s160_s1, %s160_s1 }
  0x78   :  { %p2013_p3 = scmp.lt.s32.totalorder %s2011_s19, %s2007_s18 }
  0x7a   :  { %p2014_p4 = por %p2013_p3, %p2012_p2 }
  0x7c   :  { %p2015_p5 = pnand %p2014_p4, %p2008_p1 }
  0x7e   :  { %2018 = shalt.err (!%p2015_p5)
}
  0x7f   :  { %162 = dma.hbm_to_vmem [thread:$0]  %s2864_s11, 16, %s160_s1, [#allocation21]  }
  0x80   :  { %s2357_s20 = smov [#allocation23]   ;;  %s2358_s7 = smov [#allocation26]  }
  0x81   :  { %s179_s24 = sshll.u32 %s2357_s20, 4  ;;  %s200_s22 = sshll.u32 %s2358_s7, 4  ;;  %s180_s24 = int_to_ptr.vmem [resolvable:$true] %s179_s24  ;;  %s2573_s22 = int_to_ptr.vmem [resolvable:$true] %s200_s22 }
  0x82   :  { %s2019_s5 = scalar_lea.hbm %s2866_s13, 32 }
  0x83   :  { %p2020_p6 = scmp.ne.s32.totalorder %s2866_s13, %s2019_s5  ;;  %p2023_p7 = scmp.lt.u32.totalorder %s2019_s5, %s2866_s13 }
  0x85   :  { %p2025_p8 = pnand %p2023_p7, %p2020_p6 }
  0x87   :  { %2028 = shalt.err (!%p2025_p8)
}
  0x88   :  { %s2029_s11 = scalar_lea.vmem %s180_s24, 32  ;;  %p2034_p10 = scmp.lt.s32.totalorder %s180_s24, %s180_s24 }
  0x89   :  { %p2030_p9 = scmp.ne.s32.totalorder %s180_s24, %s2029_s11  ;;  %p2035_p11 = scmp.lt.s32.totalorder %s2029_s11, %s2029_s11 }
  0x8b   :  { %p2036_p12 = por %p2035_p11, %p2034_p10 }
  0x8d   :  { %p2037_p13 = pnand %p2036_p12, %p2030_p9 }
  0x8f   :  { %2040 = shalt.err (!%p2037_p13)
}
  0x90   :  { %182 = dma.hbm_to_vmem [thread:$0]  %s2866_s13, 32, %s180_s24, [#allocation24]  }
  0x91   :  { %s2041_s19 = scalar_lea.hbm %s2868_s15, 512 }
  0x92   :  { %p2042_p0 = scmp.ne.s32.totalorder %s2868_s15, %s2041_s19  ;;  %p2045_p1 = scmp.lt.u32.totalorder %s2041_s19, %s2868_s15 }
  0x94   :  { %p2047_p2 = pnand %p2045_p1, %p2042_p0 }
  0x96   :  { %2050 = shalt.err (!%p2047_p2)
}
  0x97   :  { %s2051_s25 = scalar_lea.vmem %s2573_s22, 512  ;;  %p2056_p4 = scmp.lt.s32.totalorder %s2573_s22, %s2573_s22 }
  0x98   :  { %p2052_p3 = scmp.ne.s32.totalorder %s2573_s22, %s2051_s25  ;;  %p2057_p5 = scmp.lt.s32.totalorder %s2051_s25, %s2051_s25 }
  0x9a   :  { %p2058_p6 = por %p2057_p5, %p2056_p4 }
  0x9c   :  { %p2059_p7 = pnand %p2058_p6, %p2052_p3 }
  0x9e   :  { %2062 = shalt.err (!%p2059_p7)
}
  0x9f   :  { %206 = dma.hbm_to_vmem [thread:$0]  %s2868_s15, 512, %s2573_s22, [#allocation27], %s2351_s30, %s2351_s30, %s2352_s2  }
  0xa0   :  { %s2359_s23 = smov [#allocation29]   ;;  %s2360_s0 = smov [#allocation2]  }
  0xa1   :  { %s222_s5 = sshll.u32 %s2359_s23, 4  ;;  %s41_s3 = sshll.u32 %s2360_s0, 4  ;;  %s223_s5 = int_to_ptr.vmem [resolvable:$true] %s222_s5  ;;  %s42_s3 = int_to_ptr.vmem [resolvable:$true] %s41_s3 }
  0xa2   :  { %s2063_s11 = scalar_lea.hbm %s2870_s17, 512 }
  0xa3   :  { %p2064_p8 = scmp.ne.s32.totalorder %s2870_s17, %s2063_s11  ;;  %p2067_p9 = scmp.lt.u32.totalorder %s2063_s11, %s2870_s17 }
  0xa5   :  { %p2069_p10 = pnand %p2067_p9, %p2064_p8 }
  0xa7   :  { %2072 = shalt.err (!%p2069_p10)
}
  0xa8   :  { %s2073_s15 = scalar_lea.vmem %s223_s5, 512  ;;  %p2078_p12 = scmp.lt.s32.totalorder %s223_s5, %s223_s5 }
  0xa9   :  { %p2074_p11 = scmp.ne.s32.totalorder %s223_s5, %s2073_s15  ;;  %p2079_p13 = scmp.lt.s32.totalorder %s2073_s15, %s2073_s15 }
  0xab   :  { %p2080_p0 = por %p2079_p13, %p2078_p12 }
  0xad   :  { %p2081_p1 = pnand %p2080_p0, %p2074_p11 }
  0xaf   :  { %2084 = shalt.err (!%p2081_p1)
}
  0xb0   :  { %228 = dma.hbm_to_vmem [thread:$0]  %s2870_s17, 512, %s223_s5, [#allocation30], %s2351_s30, %s2351_s30, %s2352_s2  }
  0xb1   :  { %s2887_s20 = sld [smem:[#allocation44_spill]] }
  0xb7   :  { %s2085_s7 = scalar_lea.hbm %s2887_s20, 256 }
  0xb8   :  { %p2086_p2 = scmp.ne.s32.totalorder %s2887_s20, %s2085_s7  ;;  %p2089_p3 = scmp.lt.u32.totalorder %s2085_s7, %s2887_s20 }
  0xba   :  { %p2091_p4 = pnand %p2089_p3, %p2086_p2 }
  0xbc   :  { %2094 = shalt.err (!%p2091_p4)
}
  0xbd   :  { %s2095_s0 = scalar_lea.vmem %s42_s3, 256  ;;  %p2100_p6 = scmp.lt.s32.totalorder %s42_s3, %s42_s3 }
  0xbe   :  { %p2096_p5 = scmp.ne.s32.totalorder %s42_s3, %s2095_s0  ;;  %p2101_p7 = scmp.lt.s32.totalorder %s2095_s0, %s2095_s0 }
  0xc0   :  { %p2102_p8 = por %p2101_p7, %p2100_p6 }
  0xc2   :  { %p2103_p9 = pnand %p2102_p8, %p2096_p5 }
  0xc4   :  { %2106 = shalt.err (!%p2103_p9)
}
  0xc5   :  { %44 = dma.hbm_to_vmem [thread:$0]  %s2887_s20, 256, %s42_s3, [#allocation3]  }
  0xc6   :  { %s2361_s21 = smov [#allocation7]   ;;  %s2362_s11 = smov [#allocation10]  }
  0xc7   :  { %s61_s27 = sshll.u32 %s2361_s21, 4  ;;  %s83_s1 = sshll.u32 %s2362_s11, 4  ;;  %s62_s27 = int_to_ptr.vmem [resolvable:$true] %s61_s27  ;;  %s84_s1 = int_to_ptr.vmem [resolvable:$true] %s83_s1 }
  0xc8   :  { %s2888_s18 = sld [smem:[#allocation46_spill]] }
  0xce   :  { %s2107_s15 = scalar_lea.hbm %s2888_s18, 32 }
  0xcf   :  { %p2108_p10 = scmp.ne.s32.totalorder %s2888_s18, %s2107_s15  ;;  %p2111_p11 = scmp.lt.u32.totalorder %s2107_s15, %s2888_s18 }
  0xd1   :  { %p2113_p12 = pnand %p2111_p11, %p2108_p10 }
  0xd3   :  { %2116 = shalt.err (!%p2113_p12)
}
  0xd4   :  { %s2117_s3 = scalar_lea.vmem %s62_s27, 32  ;;  %p2122_p0 = scmp.lt.s32.totalorder %s62_s27, %s62_s27 }
  0xd5   :  { %p2118_p13 = scmp.ne.s32.totalorder %s62_s27, %s2117_s3  ;;  %p2123_p1 = scmp.lt.s32.totalorder %s2117_s3, %s2117_s3 }
  0xd7   :  { %p2124_p2 = por %p2123_p1, %p2122_p0 }
  0xd9   :  { %p2125_p3 = pnand %p2124_p2, %p2118_p13 }
  0xdb   :  { %2128 = shalt.err (!%p2125_p3)
}
  0xdc   :  { %64 = dma.hbm_to_vmem [thread:$0]  %s2888_s18, 32, %s62_s27, [#allocation6]  }
  0xdd   :  { %s2129_s24 = scalar_lea.hbm %s2857_s4, 256 }
  0xde   :  { %p2130_p4 = scmp.ne.s32.totalorder %s2857_s4, %s2129_s24  ;;  %p2133_p5 = scmp.lt.u32.totalorder %s2129_s24, %s2857_s4 }
  0xe0   :  { %p2135_p6 = pnand %p2133_p5, %p2130_p4 }
  0xe2   :  { %2138 = shalt.err (!%p2135_p6)
}
  0xe3   :  { %s2139_s21 = scalar_lea.vmem %s84_s1, 256  ;;  %p2144_p8 = scmp.lt.s32.totalorder %s84_s1, %s84_s1 }
  0xe4   :  { %p2140_p7 = scmp.ne.s32.totalorder %s84_s1, %s2139_s21  ;;  %p2145_p9 = scmp.lt.s32.totalorder %s2139_s21, %s2139_s21 }
  0xe6   :  { %p2146_p10 = por %p2145_p9, %p2144_p8 }
  0xe8   :  { %p2147_p11 = pnand %p2146_p10, %p2140_p7 }
  0xea   :  { %2150 = shalt.err (!%p2147_p11)
}
  0xeb   :  { %86 = dma.hbm_to_vmem [thread:$0]  %s2857_s4, 256, %s84_s1, [#allocation9]  }
  0xec   :  { %s2363_s28 = smov [#allocation13]   ;;  %s2364_s18 = smov [#allocation16]  }
  0xed   :  { %s105_s29 = sshll.u32 %s2363_s28, 4  ;;  %s127_s15 = sshll.u32 %s2364_s18, 4  ;;  %s106_s29 = int_to_ptr.vmem [resolvable:$true] %s105_s29  ;;  %s128_s15 = int_to_ptr.vmem [resolvable:$true] %s127_s15 }
  0xee   :  { %s2151_s9 = scalar_lea.hbm %s2859_s6, 16 }
  0xef   :  { %p2152_p12 = scmp.ne.s32.totalorder %s2859_s6, %s2151_s9  ;;  %p2155_p13 = scmp.lt.u32.totalorder %s2151_s9, %s2859_s6 }
  0xf1   :  { %p2157_p0 = pnand %p2155_p13, %p2152_p12 }
  0xf3   :  { %2160 = shalt.err (!%p2157_p0)
}
  0xf4   :  { %s2161_s4 = scalar_lea.vmem %s106_s29, 16  ;;  %s2165_s1 = scalar_lea.vmem %s106_s29, 32 }
  0xf5   :  { %p2162_p1 = scmp.ne.s32.totalorder %s106_s29, %s2161_s4  ;;  %p2166_p2 = scmp.lt.s32.totalorder %s106_s29, %s106_s29 }
  0xf6   :  { %p2167_p3 = scmp.lt.s32.totalorder %s2165_s1, %s2161_s4 }
  0xf8   :  { %p2168_p4 = por %p2167_p3, %p2166_p2 }
  0xfa   :  { %p2169_p5 = pnand %p2168_p4, %p2162_p1 }
  0xfc   :  { %2172 = shalt.err (!%p2169_p5)
}
  0xfd   :  { %108 = dma.hbm_to_vmem [thread:$0]  %s2859_s6, 16, %s106_s29, [#allocation12]  }
  0xfe   :  { %s2173_s0 = scalar_lea.hbm %s2861_s8, 16 }
  0xff   :  { %p2174_p6 = scmp.ne.s32.totalorder %s2861_s8, %s2173_s0  ;;  %p2177_p7 = scmp.lt.u32.totalorder %s2173_s0, %s2861_s8 }
 0x101   :  { %p2179_p8 = pnand %p2177_p7, %p2174_p6 }
 0x103   :  { %2182 = shalt.err (!%p2179_p8)
}
 0x104   :  { %s2183_s11 = scalar_lea.vmem %s128_s15, 16  ;;  %s2187_s28 = scalar_lea.vmem %s128_s15, 32 }
 0x105   :  { %p2184_p9 = scmp.ne.s32.totalorder %s128_s15, %s2183_s11  ;;  %p2188_p10 = scmp.lt.s32.totalorder %s128_s15, %s128_s15 }
 0x106   :  { %p2189_p11 = scmp.lt.s32.totalorder %s2187_s28, %s2183_s11 }
 0x108   :  { %p2190_p12 = por %p2189_p11, %p2188_p10 }
 0x10a   :  { %p2191_p13 = pnand %p2190_p12, %p2184_p9 }
 0x10c   :  { %2194 = shalt.err (!%p2191_p13)
}
 0x10d   :  { %130 = dma.hbm_to_vmem [thread:$0]  %s2861_s8, 16, %s128_s15, [#allocation15]  }
 0x10e   :  { %s2365_s18 = smov [#allocation19]   ;;  %s2366_s19 = smov [#allocation22]  }
 0x10f   :  { %s146_s22 = sshll.u32 %s2365_s18, 4  ;;  %s169_s9 = sshll.u32 %s2366_s19, 4  ;;  %s147_s22 = int_to_ptr.vmem [resolvable:$true] %s146_s22  ;;  %s170_s9 = int_to_ptr.vmem [resolvable:$true] %s169_s9 }
 0x110   :  { %s2195_s20 = scalar_lea.hbm %s2863_s10, 512 }
 0x111   :  { %p2196_p0 = scmp.ne.s32.totalorder %s2863_s10, %s2195_s20  ;;  %p2199_p1 = scmp.lt.u32.totalorder %s2195_s20, %s2863_s10 }
 0x113   :  { %p2201_p2 = pnand %p2199_p1, %p2196_p0 }
 0x115   :  { %2204 = shalt.err (!%p2201_p2)
}
 0x116   :  { %s2205_s8 = scalar_lea.vmem %s147_s22, 512  ;;  %p2210_p4 = scmp.lt.s32.totalorder %s147_s22, %s147_s22 }
 0x117   :  { %p2206_p3 = scmp.ne.s32.totalorder %s147_s22, %s2205_s8  ;;  %p2211_p5 = scmp.lt.s32.totalorder %s2205_s8, %s2205_s8 }
 0x119   :  { %p2212_p6 = por %p2211_p5, %p2210_p4 }
 0x11b   :  { %p2213_p7 = pnand %p2212_p6, %p2206_p3 }
 0x11d   :  { %2216 = shalt.err (!%p2213_p7)
}
 0x11e   :  { %152 = dma.hbm_to_vmem [thread:$0]  %s2863_s10, 512, %s147_s22, [#allocation18], %s2351_s30, %s2351_s30, %s2352_s2  }
 0x11f   :  { %s2217_s0 = scalar_lea.hbm %s2865_s12, 64 }
 0x120   :  { %p2218_p8 = scmp.ne.s32.totalorder %s2865_s12, %s2217_s0  ;;  %p2221_p9 = scmp.lt.u32.totalorder %s2217_s0, %s2865_s12 }
 0x122   :  { %p2223_p10 = pnand %p2221_p9, %p2218_p8 }
 0x124   :  { %2226 = shalt.err (!%p2223_p10)
}
 0x125   :  { %s2227_s11 = scalar_lea.vmem %s170_s9, 64  ;;  %p2232_p12 = scmp.lt.s32.totalorder %s170_s9, %s170_s9 }
 0x126   :  { %p2228_p11 = scmp.ne.s32.totalorder %s170_s9, %s2227_s11  ;;  %p2233_p13 = scmp.lt.s32.totalorder %s2227_s11, %s2227_s11 }
 0x128   :  { %p2234_p0 = por %p2233_p13, %p2232_p12 }
 0x12a   :  { %p2235_p1 = pnand %p2234_p0, %p2228_p11 }
 0x12c   :  { %2238 = shalt.err (!%p2235_p1)
}
 0x12d   :  { %172 = dma.hbm_to_vmem [thread:$0]  %s2865_s12, 64, %s170_s9, [#allocation21]  }
 0x12e   :  { %s2367_s2 = smov [#allocation25]   ;;  %s2239_s18 = scalar_lea.hbm %s2867_s14, 192 }
 0x12f   :  { %s188_s28 = sshll.u32 %s2367_s2, 4  ;;  %p2240_p2 = scmp.ne.s32.totalorder %s2867_s14, %s2239_s18  ;;  %s189_s28 = int_to_ptr.vmem [resolvable:$true] %s188_s28 }
 0x130   :  { %p2243_p3 = scmp.lt.u32.totalorder %s2239_s18, %s2867_s14 }
 0x132   :  { %p2245_p4 = pnand %p2243_p3, %p2240_p2 }
 0x134   :  { %2248 = shalt.err (!%p2245_p4)
}
 0x135   :  { %s2249_s20 = scalar_lea.vmem %s189_s28, 192  ;;  %p2254_p6 = scmp.lt.s32.totalorder %s189_s28, %s189_s28 }
 0x136   :  { %p2250_p5 = scmp.ne.s32.totalorder %s189_s28, %s2249_s20  ;;  %p2255_p7 = scmp.lt.s32.totalorder %s2249_s20, %s2249_s20 }
 0x138   :  { %p2256_p8 = por %p2255_p7, %p2254_p6 }
 0x13a   :  { %p2257_p9 = pnand %p2256_p8, %p2250_p5 }
 0x13c   :  { %2260 = shalt.err (!%p2257_p9)
}
 0x13d   :  { %s2368_s12 = smov 64   ;;  %s2369_s9 = smov 4  }
 0x13e   :  { %194 = dma.hbm_to_vmem [thread:$0]  %s2867_s14, 192, %s189_s28, [#allocation24], %s2368_s12, %s2368_s12, %s2369_s9  }
 0x13f   :  { %s2370_s1 = smov [#allocation28]   ;;  %s2371_s8 = smov [#allocation31]  }
 0x140   :  { %s213_s25 = sshll.u32 %s2370_s1, 4  ;;  %s235_s15 = sshll.u32 %s2371_s8, 4  ;;  %s214_s25 = int_to_ptr.vmem [resolvable:$true] %s213_s25  ;;  %s236_s15 = int_to_ptr.vmem [resolvable:$true] %s235_s15 }
 0x141   :  { %s2261_s23 = scalar_lea.hbm %s2869_s16, 16 }
 0x142   :  { %p2262_p10 = scmp.ne.s32.totalorder %s2869_s16, %s2261_s23  ;;  %p2265_p11 = scmp.lt.u32.totalorder %s2261_s23, %s2869_s16 }
 0x144   :  { %p2267_p12 = pnand %p2265_p11, %p2262_p10 }
 0x146   :  { %2270 = shalt.err (!%p2267_p12)
}
 0x147   :  { %s2271_s14 = scalar_lea.vmem %s214_s25, 16  ;;  %s2275_s27 = scalar_lea.vmem %s214_s25, 32 }
 0x148   :  { %p2272_p13 = scmp.ne.s32.totalorder %s214_s25, %s2271_s14  ;;  %p2276_p0 = scmp.lt.s32.totalorder %s214_s25, %s214_s25 }
 0x149   :  { %p2277_p1 = scmp.lt.s32.totalorder %s2275_s27, %s2271_s14 }
 0x14b   :  { %p2278_p2 = por %p2277_p1, %p2276_p0 }
 0x14d   :  { %p2279_p3 = pnand %p2278_p2, %p2272_p13 }
 0x14f   :  { %2282 = shalt.err (!%p2279_p3)
}
 0x150   :  { %216 = dma.hbm_to_vmem [thread:$0]  %s2869_s16, 16, %s214_s25, [#allocation27]  }
 0x151   :  { %s2889_s28 = sld [smem:[#allocation48_spill]] }
 0x157   :  { %s2283_s6 = scalar_lea.hbm %s2889_s28, 16 }
 0x158   :  { %p2284_p4 = scmp.ne.s32.totalorder %s2889_s28, %s2283_s6  ;;  %p2287_p5 = scmp.lt.u32.totalorder %s2283_s6, %s2889_s28 }
 0x15a   :  { %p2289_p6 = pnand %p2287_p5, %p2284_p4 }
 0x15c   :  { %2292 = shalt.err (!%p2289_p6)
}
 0x15d   :  { %s2293_s26 = scalar_lea.vmem %s236_s15, 16  ;;  %s2297_s3 = scalar_lea.vmem %s236_s15, 32 }
 0x15e   :  { %p2294_p7 = scmp.ne.s32.totalorder %s236_s15, %s2293_s26  ;;  %p2298_p8 = scmp.lt.s32.totalorder %s236_s15, %s236_s15 }
 0x15f   :  { %p2299_p9 = scmp.lt.s32.totalorder %s2297_s3, %s2293_s26 }
 0x161   :  { %p2300_p10 = por %p2299_p9, %p2298_p8 }
 0x163   :  { %p2301_p11 = pnand %p2300_p10, %p2294_p7 }
 0x165   :  { %2304 = shalt.err (!%p2301_p11)
}
 0x166   :  { %238 = dma.hbm_to_vmem [thread:$0]  %s2889_s28, 16, %s236_s15, [#allocation30]  }
 0x167   :  { %2327 = dma.done.wait [#allocation3], 256  }
 0x168   :  { %2328 = vsyncadd [#allocation3], 4294967040 }
 0x169   :  { %2329 = dma.done.wait [#allocation6], 288  }
 0x16a   :  { %2330 = vsyncadd [#allocation6], 4294967008 }
 0x16b   :  { %2331 = dma.done.wait [#allocation9], 4352  }
 0x16c   :  { %2332 = vsyncadd [#allocation9], 4294962944 }
 0x16d   :  { %2333 = dma.done.wait [#allocation12], 4112  }
 0x16e   :  { %2334 = vsyncadd [#allocation12], 4294963184 }
 0x16f   :  { %2335 = dma.done.wait [#allocation15], 528  }
 0x170   :  { %2336 = vsyncadd [#allocation15], 4294966768 }
 0x171   :  { %2337 = dma.done.wait [#allocation18], 528  }
 0x172   :  { %2338 = vsyncadd [#allocation18], 4294966768 }
 0x173   :  { %2339 = dma.done.wait [#allocation21], 80  }
 0x174   :  { %2340 = vsyncadd [#allocation21], 4294967216 }
 0x175   :  { %2341 = dma.done.wait [#allocation24], 224  }
 0x176   :  { %2342 = vsyncadd [#allocation24], 4294967072 }
 0x177   :  { %2343 = dma.done.wait [#allocation27], 528  }
 0x178   :  { %2344 = vsyncadd [#allocation27], 4294966768 }
 0x179   :  { %2345 = dma.done.wait [#allocation30], 528  }
 0x17a   :  { %2346 = vsyncadd [#allocation30], 4294966768  ;;  %v333_v0 = vld [vmem:[#allocation8 + $0x80] sm:$0xff]  ;;  %v334_v1 = vld [vmem:[#allocation8 + $0x88] sm:$0xff]  ;;  %v301_v3 = vlaneseq  ;;  %vm497_vm0 = vcmask 64512   ;;  %vm2374_vm1 = vmmov 0  }
 0x17b   :  { %v317_v2 = vld [vmem:[#allocation8] sm:$0xff]  ;;  %v1734_v4 = vpack.c.bf16 %v334_v1, %v333_v0  ;;  %v318_v5 = vld [vmem:[#allocation8 + $0x8] sm:$0xff]  ;;  %v335_v6 = vld [vmem:[#allocation8 + $0x90] sm:$0xff]  ;;  %vm773_vm2 = vcmask 261120   ;;  %vm853_vm3 = vcmask 1043456   ;;  %vm909_vm4 = vcmask 1041408  }
 0x17c   :  { %v336_v7 = vld [vmem:[#allocation8 + $0x98] sm:$0xff]  ;;  %v1736_v8 = vpack.c.bf16 %v318_v5, %v317_v2  ;;  %v319_v10 = vld [vmem:[#allocation8 + $0x10] sm:$0xff]  ;;  %v337_v12 = vld [vmem:[#allocation8 + $0xa0] sm:$0xff]  ;;  %v302_v15 = vshrl.u32 %v301_v3, 7  ;;  %v2372_v3 = vmov 0.0   ;;  %vm905_vm5 = vcmask 31744  }
 0x17d   :  { %v1738_v9 = vpack.c.bf16 %v336_v7, %v335_v6  ;;  %v320_v11 = vld [vmem:[#allocation8 + $0x18] sm:$0xff]  ;;  %1735 = vmatprep.subr.bf16.mxu0 %v1734_v4  ;;  %1767 = vmatprep.subr.bf16.mxu1 %v1734_v4  ;;  %v338_v13 = vld [vmem:[#allocation8 + $0xa8] sm:$0xff]  ;;  %v321_v17 = vld [vmem:[#allocation8 + $0x20] sm:$0xff]  ;;  %s2375_s9 = smov 96   ;;  %s2377_s7 = smov [#allocation32]  }
 0x17e   :  { %1737 = vmatpush3.bf16.msra.mxu0 %v1736_v8  ;;  %1769 = vmatpush3.bf16.msra.mxu1 %v1736_v8  ;;  %v1740_v14 = vpack.c.bf16 %v320_v11, %v319_v10  ;;  %v1742_v16 = vpack.c.bf16 %v338_v13, %v337_v12  ;;  %v322_v18 = vld [vmem:[#allocation8 + $0x28] sm:$0xff]  ;;  %v339_v19 = vld [vmem:[#allocation8 + $0xb0] sm:$0xff]  ;;  %v340_v20 = vld [vmem:[#allocation8 + $0xb8] sm:$0xff]  ;;  %v307_v22 = vsub.s32 1, %v302_v15  ;;  %v303_v47 = vsub.s32 0, %v302_v15  ;;  %s1472_s4 = sshll.u32 %s2377_s7, 4  ;;  %s1473_s4 = int_to_ptr.vmem [resolvable:$true] %s1472_s4 }
 0x17f   :  { %1739 = vmatprep.subr.bf16.mxu0 %v1738_v9  ;;  %1771 = vmatprep.subr.bf16.mxu1 %v1738_v9  ;;  %v1744_v21 = vpack.c.bf16 %v322_v18, %v321_v17  ;;  %v1746_v23 = vpack.c.bf16 %v340_v20, %v339_v19  ;;  %v323_v24 = vld [vmem:[#allocation8 + $0x30] sm:$0xff]  ;;  %v324_v25 = vld [vmem:[#allocation8 + $0x38] sm:$0xff]  ;;  %v341_v26 = vld [vmem:[#allocation8 + $0xc0] sm:$0xff]  ;;  %s2305_s1 = scalar_lea.vmem %s1473_s4, 128  ;;  %p2310_p13 = scmp.lt.s32.totalorder %s1473_s4, %s1473_s4 }
 0x180   :  { %v342_v27 = vld [vmem:[#allocation8 + $0xc8] sm:$0xff]  ;;  %v299_v29 = vld [vmem:[#allocation7] sm:$0x3]  ;;  %v2747_v30 = vld [vmem:[#allocation5 + $0x8] sm:$0xff]  ;;  %v1748_v31 = vpack.c.bf16 %v324_v25, %v323_v24  ;;  %p2306_p12 = scmp.ne.s32.totalorder %s1473_s4, %s2305_s1  ;;  %p2311_p0 = scmp.lt.s32.totalorder %s2305_s1, %s2305_s1 }
 0x181   :  { %v298_v28 = vld [vmem:[#allocation2 + $0x8] sm:$0xff]  ;;  %v308_v32 = vrot.slane %v299_v29, %v307_v22  ;;  %v422_v33 = vmul.f32 %v2747_v30, %v2747_v30  ;;  %v1750_v34 = vpack.c.bf16 %v342_v27, %v341_v26  ;;  %v343_v37 = vld [vmem:[#allocation8 + $0xd0] sm:$0xff]  ;;  %v344_v38 = vld [vmem:[#allocation8 + $0xd8] sm:$0xff]  ;;  %v304_v54 = vrot.slane %v299_v29, %v303_v47 }
 0x182   :  { %1741 = vmatpush3.bf16.msra.mxu0 %v1740_v14  ;;  %1773 = vmatpush3.bf16.msra.mxu1 %v1740_v14  ;;  %v325_v35 = vld [vmem:[#allocation8 + $0x40] sm:$0xff]  ;;  %v326_v36 = vld [vmem:[#allocation8 + $0x48] sm:$0xff]  ;;  %v1754_v42 = vpack.c.bf16 %v344_v38, %v343_v37  ;;  %v327_v43 = vld [vmem:[#allocation8 + $0x50] sm:$0xff]  ;;  %p2312_p1 = por %p2311_p0, %p2310_p13 }
 0x183   :  { %1743 = vmatprep.subr.bf16.mxu0 %v1742_v16  ;;  %1775 = vmatprep.subr.bf16.mxu1 %v1742_v16  ;;  %v2751_v39 = vmul.f32 %v308_v32, %v298_v28  ;;  %v1752_v40 = vpack.c.bf16 %v326_v36, %v325_v35  ;;  %v328_v44 = vld [vmem:[#allocation8 + $0x58] sm:$0xff]  ;;  %v345_v45 = vld [vmem:[#allocation8 + $0xe0] sm:$0xff]  ;;  %v346_v46 = vld [vmem:[#allocation8 + $0xe8] sm:$0xff] }
 0x184   :  { %487 = vmatprep.mubr.f32.mxu1 %v422_v33  ;;  %v1756_v48 = vpack.c.bf16 %v328_v44, %v327_v43  ;;  %v1758_v49 = vpack.c.bf16 %v346_v46, %v345_v45  ;;  %v329_v50 = vld [vmem:[#allocation8 + $0x60] sm:$0xff]  ;;  %v330_v51 = vld [vmem:[#allocation8 + $0x68] sm:$0xff]  ;;  %v347_v52 = vld [vmem:[#allocation8 + $0xf0] sm:$0xff]  ;;  %p2313_p2 = pnand %p2312_p1, %p2306_p12 }
 0x185   :  { %v316_v41 = vmul.f32 %v2751_v39, %v2751_v39  ;;  %v348_v53 = vld [vmem:[#allocation8 + $0xf8] sm:$0xff]  ;;  %v1760_v55 = vpack.c.bf16 %v330_v51, %v329_v50  ;;  %v331_v58 = vld [vmem:[#allocation8 + $0x70] sm:$0xff]  ;;  %v496_v1 = vld [vmem:[#allocation10 + $0x8] sm:$0xff] }
 0x186   :  { %1745 = vmatpush3.bf16.msra.mxu0 %v1744_v21  ;;  %1777 = vmatpush3.bf16.msra.mxu1 %v1744_v21  ;;  %v297_v56 = vld [vmem:[#allocation2] sm:$0xff]  ;;  %v1762_v57 = vpack.c.bf16 %v348_v53, %v347_v52  ;;  %v2757_v62 = vld [vmem:[#allocation5] sm:$0xff] }
 0x187   :  { %1747 = vmatprep.subr.bf16.mxu0 %v1746_v23  ;;  %1779 = vmatprep.subr.bf16.mxu1 %v1746_v23  ;;  %v332_v59 = vld [vmem:[#allocation8 + $0x78] sm:$0xff]  ;;  %v2755_v60 = vmul.f32 %v304_v54, %v297_v56  ;;  %v421_v0 = vmul.f32 %v2757_v62, %v2757_v62  ;;  %v495_v2 = vld [vmem:[#allocation10] sm:$0xff]  ;;  %v668_v4 = vld [vmem:[#allocation11 + $0x80] sm:$0xff] }
 0x188   :  { %413 = vmatprep.mubr.f32.mxu0 %v316_v41  ;;  %v1764_v61 = vpack.c.bf16 %v332_v59, %v331_v58  ;;  %v669_v5 = vld [vmem:[#allocation11 + $0x88] sm:$0xff]  ;;  %v652_v15 = vld [vmem:[#allocation11] sm:$0xff]  ;;  %v670_v17 = vld [vmem:[#allocation11 + $0x90] sm:$0xff] }
 0x189   :  { %v315_v63 = vmul.f32 %v2755_v60, %v2755_v60  ;;  %v1798_v6 = vpack.c.bf16 %v669_v5, %v668_v4  ;;  %v653_v16 = vld [vmem:[#allocation11 + $0x8] sm:$0xff]  ;;  %v671_v18 = vld [vmem:[#allocation11 + $0x98] sm:$0xff]  ;;  %v654_v21 = vld [vmem:[#allocation11 + $0x10] sm:$0xff] }
 0x18a   :  { %1749 = vmatpush3.bf16.msra.mxu0 %v1748_v31  ;;  %1781 = vmatpush3.bf16.msra.mxu1 %v1748_v31  ;;  %v1800_v19 = vpack.c.bf16 %v653_v16, %v652_v15  ;;  %v1802_v20 = vpack.c.bf16 %v671_v18, %v670_v17  ;;  %v655_v22 = vld [vmem:[#allocation11 + $0x18] sm:$0xff]  ;;  %v672_v24 = vld [vmem:[#allocation11 + $0xa0] sm:$0xff]  ;;  %v673_v25 = vld [vmem:[#allocation11 + $0xa8] sm:$0xff]  ;;  %v2373_v16 = vmov 0.0|0.0  }
 0x18b   :  { %1751 = vmatprep.subr.bf16.mxu0 %v1750_v34  ;;  %1783 = vmatprep.subr.bf16.mxu1 %v1750_v34  ;;  %v1804_v27 = vpack.c.bf16 %v655_v22, %v654_v21  ;;  %v1806_v28 = vpack.c.bf16 %v673_v25, %v672_v24  ;;  %v656_v29 = vld [vmem:[#allocation11 + $0x20] sm:$0xff]  ;;  %v657_v31 = vld [vmem:[#allocation11 + $0x28] sm:$0xff]  ;;  %v674_v32 = vld [vmem:[#allocation11 + $0xb0] sm:$0xff] }
 0x18c   :  { %v675_v33 = vld [vmem:[#allocation11 + $0xb8] sm:$0xff]  ;;  %v1808_v34 = vpack.c.bf16 %v657_v31, %v656_v29  ;;  %v658_v36 = vld [vmem:[#allocation11 + $0x30] sm:$0xff]  ;;  %v676_v38 = vld [vmem:[#allocation11 + $0xc0] sm:$0xff] }
 0x18d   :  { %v1810_v35 = vpack.c.bf16 %v675_v33, %v674_v32  ;;  %v659_v37 = vld [vmem:[#allocation11 + $0x38] sm:$0xff]  ;;  %v660_v43 = vld [vmem:[#allocation11 + $0x40] sm:$0xff]  ;;  %v661_v44 = vld [vmem:[#allocation11 + $0x48] sm:$0xff] }
 0x18e   :  { %1753 = vmatpush3.bf16.msra.mxu0 %v1752_v40  ;;  %1785 = vmatpush3.bf16.msra.mxu1 %v1752_v40  ;;  %v677_v40 = vld [vmem:[#allocation11 + $0xc8] sm:$0xff]  ;;  %v1812_v41 = vpack.c.bf16 %v659_v37, %v658_v36  ;;  %v678_v45 = vld [vmem:[#allocation11 + $0xd0] sm:$0xff]  ;;  %v679_v46 = vld [vmem:[#allocation11 + $0xd8] sm:$0xff]  ;;  %v1816_v47 = vpack.c.bf16 %v661_v44, %v660_v43 }
 0x18f   :  { %1755 = vmatprep.subr.bf16.mxu0 %v1754_v42  ;;  %1787 = vmatprep.subr.bf16.mxu1 %v1754_v42  ;;  %v1814_v42 = vpack.c.bf16 %v677_v40, %v676_v38  ;;  %v663_v50 = vld [vmem:[#allocation11 + $0x58] sm:$0xff]  ;;  %v680_v51 = vld [vmem:[#allocation11 + $0xe0] sm:$0xff]  ;;  %v681_v52 = vld [vmem:[#allocation11 + $0xe8] sm:$0xff] }
 0x190   :  { %v1822_v54 = vpack.c.bf16 %v681_v52, %v680_v51  ;;  %v665_v56 = vld [vmem:[#allocation11 + $0x68] sm:$0xff]  ;;  %v682_v58 = vld [vmem:[#allocation11 + $0xf0] sm:$0xff]  ;;  %v683_v59 = vld [vmem:[#allocation11 + $0xf8] sm:$0xff] }
 0x191   :  { %v1493_v22 = vld [vmem:[#allocation16] ss:$0 sm:$0xff]  ;;  %v954_v33 = vld [vmem:[#allocation26] sm:$0xff]  ;;  %v2791_v38 = vld [vmem:[#allocation22] sm:$0xf] }
 0x192   :  { %1757 = vmatpush3.bf16.msra.mxu0 %v1756_v48  ;;  %1789 = vmatpush3.bf16.msra.mxu1 %v1756_v48  ;;  %v1818_v48 = vpack.c.bf16 %v679_v46, %v678_v45  ;;  %v1499_v44 = vld [vmem:[#allocation28] ss:$0 sm:$0xff]  ;;  %v1496_v45 = vld [vmem:[#allocation17] ss:$0 sm:$0xff] }
 0x193   :  { %1759 = vmatprep.subr.bf16.mxu0 %v1758_v49  ;;  %1791 = vmatprep.subr.bf16.mxu1 %v1758_v49  ;;  %v662_v49 = vld [vmem:[#allocation11 + $0x50] sm:$0xff] }
 0x194   :  { %v1820_v53 = vpack.c.bf16 %v663_v50, %v662_v49  ;;  %1037 = vrot.lane.b32.xlu1 %v1499_v44, %s2375_s9  ;;  %v1384_v44 = vld [vmem:[#allocation29 + $0x18] sm:$0xff] }
 0x196   :  { %1761 = vmatpush3.bf16.msra.mxu0 %v1760_v55  ;;  %1793 = vmatpush3.bf16.msra.mxu1 %v1760_v55  ;;  %v664_v55 = vld [vmem:[#allocation11 + $0x60] sm:$0xff] }
 0x197   :  { %1763 = vmatprep.subr.bf16.mxu0 %v1762_v57  ;;  %1795 = vmatprep.subr.bf16.mxu1 %v1762_v57  ;;  %v1824_v57 = vpack.c.bf16 %v665_v56, %v664_v55  ;;  %v1042_v56 = vld [vmem:[#allocation25] sm:$0xf] }
 0x19a   :  { %1765 = vmatpush3.bf16.msra.mxu0 %v1764_v61  ;;  %1797 = vmatpush3.bf16.msra.mxu1 %v1764_v61  ;;  %v1826_v61 = vpack.c.bf16 %v683_v59, %v682_v58  ;;  %v1095_v59 = vld [vmem:[#allocation25 + $0x4] sm:$0xf] }
 0x19b   :  { %501 = vmatprep.subr.mxu0 %v496_v1  ;;  %577 = vmatprep.subr.mxu1 %v496_v1 }
 0x19d   :  { %414 = vmatmul.mubr.f32.vlgmr.msra.gmra.mrb[0].mxu0 %v315_v63  ;;  %488 = vmatmul.mubr.f32.vlgmr.msra.gmra.mrb[0].mxu1 %v421_v0  ;;  %v666_v63 = vld [vmem:[#allocation11 + $0x70] sm:$0xff]  ;;  %v667_v0 = vld [vmem:[#allocation11 + $0x78] sm:$0xff] }
 0x19e   :  { %502 = vmatpush1.msra.mxu0 %v495_v2  ;;  %565 = vmatprep.mubr.f32.mxu0 %v2372_v3  ;;  %v1828_v1 = vpack.c.bf16 %v667_v0, %v666_v63  ;;  %v1151_v0 = vld [vmem:[#allocation25 + $0x8] sm:$0xf] }
 0x19f   :  { %578 = vmatpush1.msra.mxu1 %v495_v2  ;;  %641 = vmatprep.mubr.f32.mxu1 %v2372_v3 }
 0x1a0   :  { %1799 = vmatprep.subr.bf16.mxu0 %v1798_v6  ;;  %1830 = vmatprep.subr.bf16.mxu1 %v2373_v16 }
 0x270   :  { %v1541_v7 = vpop.f32.mrb[0].mxu0  ;;  %v1576_v8 = vpop.f32.mrb[0].mxu1 }
 0x271   :  { %v1542_v9 = vpop.f32.mrb[1].mxu0  ;;  %v1577_v10 = vpop.f32.mrb[1].mxu1 }
 0x272   :  { %v1543_v11 = vadd.f32 %v1542_v9, %v1541_v7  ;;  %v1578_v12 = vadd.f32 %v1577_v10, %v1576_v8 }
 0x274   :  { %v419_v13 = vmax.f32 %v1543_v11, 1e-24  ;;  %v493_v14 = vmax.f32 %v1578_v12, 1e-24 }
 0x276   :  { %1883 = vrsqrt.f32 %v419_v13  ;;  %v762_v13 = vld [vmem:[#allocation14] sm:$0xff] }
 0x277   :  { %1885 = vrsqrt.f32 %v493_v14  ;;  %v763_v14 = vld [vmem:[#allocation14 + $0x8] sm:$0xff] }
 0x278   :  { %v1831_v15 = vpack.c.bf16 %v763_v14, %v762_v13 }
 0x280   :  { %v1884_v23 = vpop.eup %1883 }
 0x281   :  { %v1886_v26 = vpop.eup %1885  ;;  %1490 = vmatmul.mubr.msk.f32.vlgmr.msra.gmra.mrb[2].mxu0 %vm497_vm0, %v1884_v23 }
 0x282   :  { %1491 = vmatmul.mubr.msk.f32.vlgmr.msra.gmra.mrb[2].mxu1 %vm497_vm0, %v1886_v26  ;;  %1801 = vmatpush3.bf16.msra.mxu0 %v1800_v19 }
 0x283   :  { %1803 = vmatprep.subr.bf16.mxu0 %v1802_v20  ;;  %1832 = vmatpush3.bf16.msra.mxu1 %v1831_v15 }
 0x284   :  { %1833 = vmatprep.subr.bf16.mxu1 %v2373_v16  ;;  %1656 = vmatprep.mubr.msk.f32.mxu1 %vm2374_vm1, %v2372_v3 }
 0x286   :  { %1805 = vmatpush3.bf16.msra.mxu0 %v1804_v27 }
 0x287   :  { %1807 = vmatprep.subr.bf16.mxu0 %v1806_v28  ;;  %v2783_v28 = vld [vmem:[#allocation23] sm:$0x3] }
 0x28a   :  { %1809 = vmatpush3.bf16.msra.mxu0 %v1808_v34  ;;  %v955_v34 = vld [vmem:[#allocation26 + $0x8] sm:$0xff] }
 0x28b   :  { %1811 = vmatprep.subr.bf16.mxu0 %v1810_v35  ;;  %v1837_v40 = vpack.c.bf16 %v955_v34, %v954_v33 }
 0x28e   :  { %1813 = vmatpush3.bf16.msra.mxu0 %v1812_v41  ;;  %v956_v41 = vld [vmem:[#allocation26 + $0x10] sm:$0xff] }
 0x28f   :  { %1815 = vmatprep.subr.bf16.mxu0 %v1814_v42  ;;  %v957_v42 = vld [vmem:[#allocation26 + $0x18] sm:$0xff] }
 0x290   :  { %v1840_v43 = vpack.c.bf16 %v957_v42, %v956_v41  ;;  %v1381_v41 = vld [vmem:[#allocation29] sm:$0xff]  ;;  %v1382_v42 = vld [vmem:[#allocation29 + $0x8] sm:$0xff] }
 0x292   :  { %1817 = vmatpush3.bf16.msra.mxu0 %v1816_v47 }
 0x293   :  { %1819 = vmatprep.subr.bf16.mxu0 %v1818_v48 }
 0x296   :  { %1821 = vmatpush3.bf16.msra.mxu0 %v1820_v53 }
 0x297   :  { %1823 = vmatprep.subr.bf16.mxu0 %v1822_v54 }
 0x29a   :  { %1825 = vmatpush3.bf16.msra.mxu0 %v1824_v57 }
 0x29b   :  { %1827 = vmatprep.subr.bf16.mxu0 %v1826_v61 }
 0x29e   :  { %1829 = vmatpush3.bf16.msra.mxu0 %v1828_v1 }
 0x29f   :  { %1688 = vmatprep.subr.bf16.mxu0 %v2372_v3 }
 0x354   :  { %v567_v2 = vpop.f32.mrb[2].mxu0 }
 0x355   :  { %v572_v4 = vmul.f32 %v567_v2, %v2755_v60  ;;  %v643_v5 = vpop.f32.mrb[2].mxu1  ;;  %v569_v6 = vpop.f32.mrb[3].mxu0  ;;  %v764_v60 = vld [vmem:[#allocation14 + $0x10] sm:$0xff] }
 0x356   :  { %v648_v7 = vmul.f32 %v643_v5, %v2757_v62  ;;  %v573_v8 = vmul.f32 %v569_v6, %v2751_v39  ;;  %v645_v9 = vpop.f32.mrb[3].mxu1  ;;  %v765_v62 = vld [vmem:[#allocation14 + $0x18] sm:$0xff]  ;;  %v1206_v6 = vld [vmem:[#allocation19] sm:$0xff] }
 0x357   :  { %v649_v10 = vmul.f32 %v645_v9, %v2747_v30  ;;  %v1834_v17 = vpack.c.bf16 %v765_v62, %v764_v60  ;;  %v1492_v39 = vld [vmem:[#allocation13] ss:$0 sm:$0xff] }
 0x358   :  { %v650_v11 = vadd.f32 %v648_v7, %v572_v4  ;;  %v1207_v7 = vld [vmem:[#allocation19 + $0x8] sm:$0xff] }
 0x359   :  { %v651_v12 = vadd.f32 %v649_v10, %v573_v8  ;;  %1835 = vmatpush3.bf16.msra.mxu1 %v1834_v17  ;;  %v1208_v8 = vld [vmem:[#allocation19 + $0x10] sm:$0xff]  ;;  %v1843_v9 = vpack.c.bf16 %v1207_v7, %v1206_v6  ;;  %v1209_v10 = vld [vmem:[#allocation19 + $0x18] sm:$0xff] }
 0x35a   :  { %1659 = vmatprep.subr.bf16.mxu1 %v2372_v3 }
 0x35b   :  { %755 = vmatprep.mubr.f32.mxu0 %v651_v12 }
 0x35c   :  { %756 = vmatmul.mubr.f32.vlgmr.msra.gmra.mrb[4].mxu0 %v650_v11  ;;  %v1846_v11 = vpack.c.bf16 %v1209_v10, %v1208_v8 }
 0x35d   :  { %1690 = vmatprep.mubr.msk.bf16.mxu0 %vm2374_vm1, %v2372_v3 }
 0x42f   :  { %v1611_v30 = vpop.f32.mrb[4].mxu0 }
 0x430   :  { %v1612_v18 = vpop.f32.mrb[5].mxu0 }
 0x431   :  { %v1613_v19 = vadd.f32 %v1612_v18, %v1611_v30 }
 0x433   :  { %v758_v20 = vadd.f32 %v1613_v19, %v1492_v39  ;;  %v1038_v39 = vpop.permute.xlu1 %1037 }
 0x435   :  { %v761_v21 = vmax.f32 %v758_v20, 0.0 }
 0x437   :  { %1657 = vmatmul.mubr.msk.f32.vlgmr.msra.gmra.mrb[4].mxu1 %vm773_vm2, %v761_v21 }
 0x438   :  { %1661 = vmatprep.mubr.msk.bf16.mxu1 %vm2374_vm1, %v2372_v3 }
 0x50a   :  { %v843_v23 = vpop.f32.mrb[4].mxu1 }
 0x50b   :  { %v844_v24 = vadd.f32 %v1493_v22, %v843_v23  ;;  %v1658_v25 = vpop.f32.mrb[5].mxu1 }
 0x50d   :  { %v849_v26 = vpack.c.bf16 %v844_v24, %v844_v24 }
 0x50f   :  { %v855_v27 = vsel %vm853_vm3, %v849_v26, 0 }
 0x510   :  { %1660 = vmatpush3.bf16.msra.mxu1 %v855_v27 }
 0x511   :  { %1665 = vmatprep.subr.bf16.mxu1 %v2372_v3 }
 0x513   :  { %1662 = vmatmul.mubr.msk.bf16.vlgmr.msra.gmra.mrb[8].mxu1 %vm497_vm0, %v2783_v28 }
 0x514   :  { %1667 = vmatprep.mubr.msk.bf16.mxu1 %vm2374_vm1, %v2372_v3 }
 0x5e6   :  { %v891_v29 = vpop.f32.mrb[8].mxu1 }
 0x5e7   :  { %v898_v31 = vpack.c.bf16 %v891_v29, %v891_v29  ;;  %v1663_v32 = vpop.f32.mrb[9].mxu1 }
 0x5e8   :  { %v894_v35 = vpop.f32.mrb[10].mxu1 }
 0x5e9   :  { %v911_v36 = vsel %vm909_vm4, %v898_v31, 0  ;;  %v1664_v37 = vpop.f32.mrb[11].mxu1 }
 0x5ea   :  { %1666 = vmatpush3.bf16.msra.mxu1 %v911_v36 }
 0x5eb   :  { %1836 = vmatprep.subr.bf16.mxu1 %v2373_v16 }
 0x5ed   :  { %1668 = vmatmul.mubr.msk.bf16.vlgmr.msra.gmra.mrb[12].mxu1 %vm905_vm5, %v2791_v38 }
 0x5ee   :  { %1838 = vmatpush3.bf16.msra.mxu1 %v1837_v40  ;;  %1679 = vmatprep.mubr.msk.f32.mxu1 %vm2374_vm1, %v2372_v3 }
 0x5ef   :  { %1839 = vmatprep.subr.bf16.mxu1 %v2373_v16 }
 0x5f2   :  { %1841 = vmatpush3.bf16.msra.mxu1 %v1840_v43  ;;  %v1849_v43 = vpack.c.bf16 %v1382_v42, %v1381_v41 }
 0x5f3   :  { %1682 = vmatprep.subr.bf16.mxu1 %v2372_v3 }
 0x6c0   :  { %v947_v46 = vpop.f32.mrb[12].mxu1 }
 0x6c1   :  { %v948_v47 = vadd.f32 %v1496_v45, %v947_v46  ;;  %v1669_v48 = vpop.f32.mrb[13].mxu1  ;;  %v1505_v45 = vld [vmem:[#allocation20] ss:$0 sm:$0xff] }
 0x6c2   :  { %v950_v49 = vpop.f32.mrb[14].mxu1 }
 0x6c3   :  { %v953_v50 = vmax.f32 %v948_v47, 0.0  ;;  %v1670_v51 = vpop.f32.mrb[15].mxu1 }
 0x6c5   :  { %1680 = vmatmul.mubr.msk.f32.vlgmr.msra.gmra.mrb[6].mxu1 %vm773_vm2, %v953_v50 }
 0x6c6   :  { %1684 = vmatprep.mubr.msk.bf16.mxu1 %vm2374_vm1, %v2372_v3 }
 0x798   :  { %v1027_v52 = vpop.f32.mrb[6].mxu1 }
 0x799   :  { %v1041_v53 = vpack.c.bf16 %v1027_v52, %v1027_v52  ;;  %v1681_v54 = vpop.f32.mrb[7].mxu1  ;;  %v1040_v19 = vadd.f32 %v1038_v39, %v1027_v52 }
 0x79b   :  { %1097 = vrot.lane.b32.xlu0 %v1041_v53, %s2375_s9  ;;  %v1047_v55 = vsel %vm853_vm3, %v1041_v53, 0 }
 0x79c   :  { %1683 = vmatpush3.bf16.msra.mxu1 %v1047_v55 }
 0x79d   :  { %1694 = vmatprep.subr.bf16.mxu1 %v2372_v3 }
 0x79f   :  { %1152 = vrot.lane.b32.xlu0 %v1041_v53, %s2368_s12  ;;  %1685 = vmatmul.mubr.msk.bf16.vlgmr.msra.gmra.mrb[16].mxu1 %vm497_vm0, %v1042_v56  ;;  %s2376_s12 = smov 32  }
 0x7a0   :  { %1696 = vmatprep.mubr.msk.bf16.mxu1 %vm2374_vm1, %v2372_v3 }
 0x80d   :  { %v1098_v57 = vpop.permute.xlu0 %1097 }
 0x80e   :  { %v1103_v58 = vsel %vm853_vm3, %v1098_v57, 0 }
 0x80f   :  { %1689 = vmatpush3.bf16.msra.mxu0 %v1103_v58 }
 0x810   :  { %1842 = vmatprep.subr.bf16.mxu0 %v2373_v16 }
 0x811   :  { %v1153_v61 = vpop.permute.xlu0 %1152 }
 0x812   :  { %v1158_v63 = vsel %vm853_vm3, %v1153_v61, 0  ;;  %1691 = vmatmul.mubr.msk.bf16.vlgmr.msra.gmra.mrb[8].mxu0 %vm497_vm0, %v1095_v59 }
 0x813   :  { %1695 = vmatpush3.bf16.msra.mxu1 %v1158_v63  ;;  %1708 = vmatprep.mubr.msk.f32.mxu0 %vm2374_vm1, %v2372_v3 }
 0x814   :  { %1717 = vmatprep.subr.bf16.mxu1 %v2372_v3  ;;  %1844 = vmatpush3.bf16.msra.mxu0 %v1843_v9 }
 0x815   :  { %1845 = vmatprep.subr.bf16.mxu0 %v2373_v16 }
 0x816   :  { %1697 = vmatmul.mubr.msk.bf16.vlgmr.msra.gmra.mrb[20].mxu1 %vm497_vm0, %v1151_v0 }
 0x817   :  { %1719 = vmatprep.mubr.msk.bf16.mxu1 %vm2374_vm1, %v2372_v3 }
 0x818   :  { %1847 = vmatpush3.bf16.msra.mxu0 %v1846_v11 }
 0x819   :  { %1711 = vmatprep.subr.bf16.mxu0 %v2372_v3 }
 0x872   :  { %v1083_v1 = vpop.f32.mrb[16].mxu1 }
 0x873   :  { %1090 = vrot.lane.b32.xlu1 %v1083_v1, %s2375_s9  ;;  %v1686_v2 = vpop.f32.mrb[17].mxu1 }
 0x874   :  { %v1086_v4 = vpop.f32.mrb[18].mxu1 }
 0x875   :  { %v1687_v5 = vpop.f32.mrb[19].mxu1 }
 0x8e5   :  { %v1139_v12 = vpop.f32.mrb[8].mxu0  ;;  %v1091_v18 = vpop.permute.xlu1 %1090 }
 0x8e6   :  { %1146 = vrot.lane.b32.xlu0 %v1139_v12, %s2375_s9  ;;  %v1692_v13 = vpop.f32.mrb[9].mxu0  ;;  %v1093_v21 = vadd.f32 %v1091_v18, %v1040_v19 }
 0x8e7   :  { %v1142_v14 = vpop.f32.mrb[10].mxu0 }
 0x8e8   :  { %v1693_v15 = vpop.f32.mrb[11].mxu0 }
 0x8e9   :  { %v1194_v60 = vpop.f32.mrb[20].mxu1 }
 0x8ea   :  { %1201 = vrot.lane.b32.xlu1 %v1194_v60, %s2375_s9  ;;  %v1698_v62 = vpop.f32.mrb[21].mxu1 }
 0x8eb   :  { %v1197_v17 = vpop.f32.mrb[22].mxu1 }
 0x8ec   :  { %v1699_v30 = vpop.f32.mrb[23].mxu1 }
 0x958   :  { %v1147_v20 = vpop.permute.xlu0 %1146 }
 0x959   :  { %v1149_v22 = vadd.f32 %v1147_v20, %v1093_v21 }
 0x95c   :  { %v1202_v23 = vpop.permute.xlu1 %1201 }
 0x95d   :  { %v1204_v24 = vadd.f32 %v1202_v23, %v1149_v22 }
 0x95f   :  { %v1205_v25 = vmax.f32 %v1204_v24, 0.0 }
 0x961   :  { %1211 = vrot.lane.b32.xlu0 %v1205_v25, %s2376_s12 }
 0x9d3   :  { %v1212_v26 = vpop.permute.xlu0 %1211 }
 0x9d4   :  { %1709 = vmatmul.mubr.msk.f32.vlgmr.msra.gmra.mrb[6].mxu0 %vm773_vm2, %v1212_v26 }
 0x9d5   :  { %1713 = vmatprep.mubr.msk.bf16.mxu0 %vm2374_vm1, %v2372_v3 }
 0xaa7   :  { %v1281_v27 = vpop.f32.mrb[6].mxu0 }
 0xaa8   :  { %v1286_v29 = vpack.c.bf16 %v1281_v27, %v1281_v27  ;;  %v1710_v31 = vpop.f32.mrb[7].mxu0 }
 0xaaa   :  { %v1288_v32 = vsel %vm853_vm3, %v1286_v29, 0 }
 0xaab   :  { %1712 = vmatpush3.bf16.msra.mxu0 %v1288_v32 }
 0xaac   :  { %1848 = vmatprep.subr.bf16.mxu0 %v2373_v16 }
 0xaae   :  { %1714 = vmatmul.mubr.msk.bf16.vlgmr.msra.gmra.mrb[12].mxu0 %vm497_vm0, %v2783_v28  ;;  %v1383_v28 = vld [vmem:[#allocation29 + $0x10] sm:$0xff] }
 0xaaf   :  { %1731 = vmatprep.mubr.msk.f32.mxu0 %vm2374_vm1, %v2372_v3  ;;  %1850 = vmatpush3.bf16.msra.mxu0 %v1849_v43  ;;  %v1852_v3 = vpack.c.bf16 %v1384_v44, %v1383_v28 }
 0xab0   :  { %1851 = vmatprep.subr.bf16.mxu0 %v2373_v16 }
 0xab3   :  { %1853 = vmatpush3.bf16.msra.mxu0 %v1852_v3 }
 0xb81   :  { %v1324_v33 = vpop.f32.mrb[12].mxu0 }
 0xb82   :  { %v1330_v34 = vpack.c.bf16 %v1324_v33, %v1324_v33  ;;  %v1715_v35 = vpop.f32.mrb[13].mxu0 }
 0xb83   :  { %v1327_v36 = vpop.f32.mrb[14].mxu0 }
 0xb84   :  { %v1338_v37 = vsel %vm909_vm4, %v1330_v34, 0  ;;  %v1716_v40 = vpop.f32.mrb[15].mxu0 }
 0xb85   :  { %1718 = vmatpush3.bf16.msra.mxu1 %v1338_v37 }
 0xb88   :  { %1720 = vmatmul.mubr.msk.bf16.vlgmr.msra.gmra.mrb[24].mxu1 %vm905_vm5, %v2791_v38  ;;  %v1507_v38 = vld [vmem:[#allocation31] ss:$0 sm:$0xff] }
 0xc5b   :  { %v1374_v46 = vpop.f32.mrb[24].mxu1 }
 0xc5c   :  { %v1375_v47 = vadd.f32 %v1505_v45, %v1374_v46  ;;  %v1721_v48 = vpop.f32.mrb[25].mxu1 }
 0xc5d   :  { %v1377_v49 = vpop.f32.mrb[26].mxu1 }
 0xc5e   :  { %v1380_v50 = vmax.f32 %v1375_v47, 0.0  ;;  %v1722_v51 = vpop.f32.mrb[27].mxu1 }
 0xc60   :  { %1732 = vmatmul.mubr.msk.f32.vlgmr.msra.gmra.mrb[16].mxu0 %vm773_vm2, %v1380_v50 }
 0xd33   :  { %v1461_v52 = vpop.f32.mrb[16].mxu0 }
 0xd34   :  { %v1462_v53 = vadd.f32 %v1507_v38, %v1461_v52  ;;  %v1733_v54 = vpop.f32.mrb[17].mxu0 }
 0xd36   :  { %1465 = vst.msk [vmem:[#allocation32] sm:$0xff] %vm773_vm2, %v1462_v53 }
 0xd37   :  { %2316 = shalt.err (!%p2313_p2)
}
 0xd38   :  { %s2890_s15 = sld [smem:[#allocation49_spill]] }
 0xd3e   :  { %s2317_s13 = scalar_lea.hbm %s2890_s15, 128 }
 0xd3f   :  { %p2318_p3 = scmp.ne.s32.totalorder %s2890_s15, %s2317_s13  ;;  %p2321_p4 = scmp.lt.u32.totalorder %s2317_s13, %s2890_s15 }
 0xd41   :  { %p2323_p5 = pnand %p2321_p4, %p2318_p3 }
 0xd43   :  { %2326 = shalt.err (!%p2323_p5)
}
 0xd44   :  { %1475 = dma.vmem_to_hbm [thread:$0]  %s1473_s4, 128, %s2890_s15, [#allocation4]  }
 0xd45   :  { %2347 = dma.done.wait [#allocation4], 128  }
 0xd46   :  { %2348 = vsyncadd [#allocation4], 4294967168 }
 0xd47   :  { %1479 = vsyncpa [#allocation3], 1 }
 0xd48   :  { %1480 = vsyncpa [#allocation6], 1 }
 0xd49   :  { %1481 = vsyncpa [#allocation9], 1 }
 0xd4a   :  { %1482 = vsyncpa [#allocation12], 1 }
 0xd4b   :  { %1483 = vsyncpa [#allocation15], 1 }
 0xd4c   :  { %1484 = vsyncpa [#allocation18], 1 }
 0xd4d   :  { %1485 = vsyncpa [#allocation21], 1 }
 0xd4e   :  { %1486 = vsyncpa [#allocation24], 1 }
 0xd4f   :  { %1487 = vsyncpa [#allocation27], 1 }
 0xd50   :  { %1488 = vsyncpa [#allocation30], 1 }
 0xd51   :  { %1489 = vsyncpa [#allocation4], 1 }

</bundles_post_ra>
